<compile_context>
chip_gen: v5e
topology: v5e:2x2
jax: 0.10.0
libtpu: 0.0.40
codegen_flags: <defaults>
</compile_context>

<pallas_src>
import jax
import jax.numpy as jnp
from jax import lax
from jax.experimental import pallas as pl
from jax.experimental.pallas import tpu as pltpu

OUT_CHANNELS = 4
BN_EPS = 1e-5
H = W = 16          # input spatial size the kernel is specialized for
H2, W2 = 8, 8       # after pool 1
H4, W4 = 4, 4       # after pool 2


def _round_up(a, m):
    return ((a + m - 1) // m) * m


# --------------------------------------------------------------------------- #
# Fused kernel: conv stack + pooling + BN/ReLU + fc head + final scaling
# --------------------------------------------------------------------------- #
def _fused_kernel(TB):
    f32 = jnp.float32

    def kernel(x1_ref, xs_ref, w1_ref, w2_ref, w3_ref, w4_ref,
               bn_ref, wfc_ref, hv_ref, fc2b_ref, out_ref,
               sbuf2, sbuf3, sbuf4):
        # ----- layer 1: conv(1->16, 3x3, pad=1) as ONE lane-packed MXU matmul --
        # x1_ref rows = (h, b), lanes = 3x18 haloed pixel window (padded to 64).
        # w1_ref cols are ordered (w-parity, w//2, c) so the W-pool is a lane split.
        y1 = jnp.dot(x1_ref[...], w1_ref[...], preferred_element_type=f32)   # (16*TB, 256)

        # maxpool 2x2: W direction = lane-parity halves, H direction = row-block pairs
        mw = jnp.maximum(y1[:, 0:128], y1[:, 128:256])                        # (16*TB, 128)
        m4 = mw.reshape(H2, 2, TB, 128)
        pooled1 = jnp.maximum(m4[:, 0], m4[:, 1]).reshape(H2 * TB, 128)       # rows=(h2,b), lanes=(w2,c)
        z1 = jnp.maximum(pooled1 * bn_ref[0:1, :] + bn_ref[1:2, :], 0.0)

        # ----- layer 2: conv(16->16), kw folded into K (3 banded matmuls) ------
        # Row-haloed scratch: TB zero rows above/below give the h zero padding and
        # (rows being (h, b)-ordered) there is no cross-batch bleed to mask.
        sbuf2[0:TB, :] = jnp.zeros((TB, 128), f32)
        sbuf2[(H2 + 1) * TB:(H2 + 2) * TB, :] = jnp.zeros((TB, 128), f32)
        sbuf2[TB:(H2 + 1) * TB, :] = z1
        acc = jnp.zeros((H2 * TB, 128), f32)
        for kh in range(3):
            acc = acc + jnp.dot(sbuf2[kh * TB:(kh + H2) * TB, :], w2_ref[kh],
                                preferred_element_type=f32)

        a4 = acc.reshape(H4, 2, TB, 128)
        ph = jnp.maximum(a4[:, 0], a4[:, 1]).reshape(H4 * TB, 128)
        pooled2 = jnp.maximum(ph[:, 0:64], ph[:, 64:128])                     # rows=(h4,b), lanes=(w4,c)
        z2 = jnp.maximum(pooled2 * bn_ref[2:3, 0:64] + bn_ref[3:4, 0:64], 0.0)

        # ----- layer 3: conv(16->8) -> BN -> ReLU ------------------------------
        sbuf3[0:TB, :] = jnp.zeros((TB, 64), f32)
        sbuf3[(H4 + 1) * TB:(H4 + 2) * TB, :] = jnp.zeros((TB, 64), f32)
        sbuf3[TB:(H4 + 1) * TB, :] = z2
        acc = jnp.zeros((H4 * TB, 32), f32)
        for kh in range(3):
            acc = acc + jnp.dot(sbuf3[kh * TB:(kh + H4) * TB, :], w3_ref[kh],
                                preferred_element_type=f32)
        z3 = jnp.maximum(acc * bn_ref[4:5, 0:32] + bn_ref[5:6, 0:32], 0.0)    # (4*TB, 32)

        # ----- layer 4: conv(8->8) -> BN -> ReLU -------------------------------
        sbuf4[0:TB, :] = jnp.zeros((TB, 32), f32)
        sbuf4[(H4 + 1) * TB:(H4 + 2) * TB, :] = jnp.zeros((TB, 32), f32)
        sbuf4[TB:(H4 + 1) * TB, :] = z3
        acc = jnp.zeros((H4 * TB, 32), f32)
        for kh in range(3):
            acc = acc + jnp.dot(sbuf4[kh * TB:(kh + H4) * TB, :], w4_ref[kh],
                                preferred_element_type=f32)
        z4 = jnp.maximum(acc * bn_ref[6:7, 0:32] + bn_ref[7:8, 0:32], 0.0)    # rows=(i,b), lanes=(j,c)

        # adaptive_avg_pool2d((4,4)) is the identity on a 4x4 map.
        # TODO(synk): general AdaptiveAvgPool2d for spatial sizes other than 16x16.

        # ----- head: fc (4 contiguous-slab dots) -> ReLU -> fc2 -> scale -------
        h = jnp.dot(z4[0:TB, :], wfc_ref[0], preferred_element_type=f32)
        for i in range(1, H4):
            h = h + jnp.dot(z4[i * TB:(i + 1) * TB, :], wfc_ref[i],
                            preferred_element_type=f32)
        h = jnp.maximum(h + hv_ref[0:1, :], 0.0)                              # (TB, 128)
        o = jnp.sum(h * hv_ref[1:2, :], axis=1, keepdims=True) + fc2b_ref[...]  # (TB, 1)

        # final = sum_c(x_in) * scalar, emitted as a lane-dense (TB, 256) slab
        out_ref[...] = xs_ref[...] * o

    return kernel


# --------------------------------------------------------------------------- #
# Wrapper: weight banding / BN folding / layout plumbing, batch-blocked grid
# --------------------------------------------------------------------------- #
def powernet_change_forward(x, params, *, batch_block=32):
    B, C_in, D, Hh, Ww = x.shape
    assert C_in == 1, "module is defined with in_channels == 1"
    assert D >= OUT_CHANNELS
    assert Hh == H and Ww == W, "adaptive pool implemented as identity for 16x16 inputs"
    f32 = jnp.float32

    TB = _round_up(min(batch_block, _round_up(B, 8)), 8)   # multiple of 8 for free reshapes
    b_pad = _round_up(B, TB)
    nblk = b_pad // TB

    # ---- layer-1 weight: (kh, w') haloed window rows -> (parity, w//2, c) cols
    w1 = params['w1'].astype(f32)                                    # (16, 1, 3, 3)
    r = jnp.arange(54)
    kh_r, wp_r = r // 18, r % 18
    n = jnp.arange(256)
    par, rest = n // 128, n % 128
    wh, ch = rest // 16, rest % 16
    wcol = 2 * wh + par
    kw = wp_r[:, None] - wcol[None, :]
    vals = w1[ch[None, :], 0, kh_r[:, None], jnp.clip(kw, 0, 2)]
    w1_big = jnp.where((kw >= 0) & (kw <= 2), vals, 0.0)
    w1_big = jnp.pad(w1_big, ((0, 10), (0, 0)))                      # (64, 256)

    # ---- layers 2-4: per-kh banded matrices over lane-packed (w, c) ----------
    def band_weight(w, in_w, cin, out_w, cout, parity_split):
        rr = jnp.arange(in_w * cin)
        win, ci = rr // cin, rr % cin
        nn = jnp.arange(out_w * cout)
        if parity_split:
            half = (out_w * cout) // 2
            p, rem = nn // half, nn % half
            wo = 2 * (rem // cout) + p
            co = rem % cout
        else:
            wo, co = nn // cout, nn % cout
        kk = win[:, None] - wo[None, :] + 1
        valid = (kk >= 0) & (kk <= 2)
        kkc = jnp.clip(kk, 0, 2)
        mats = []
        for khh in range(3):
            v = w[co[None, :], ci[:, None], khh, kkc]
            mats.append(jnp.where(valid, v, 0.0))
        return jnp.stack(mats, 0).astype(f32)

    w2_big = band_weight(params['w2'].astype(f32), 8, 16, 8, 16, True)    # (3, 128, 128)
    w3_big = band_weight(params['w3'].astype(f32), 4, 16, 4, 8, False)    # (3, 64, 32)
    w4_big = band_weight(params['w4'].astype(f32), 4, 8, 4, 8, False)     # (3, 32, 32)

    # ---- fold conv bias + eval-mode BN into scale/shift, tiled over lanes ----
    def fold(b, g, beta, m, v):
        s = g / jnp.sqrt(v + BN_EPS)
        return s.astype(f32), (b * s + beta - m * s).astype(f32)

    s1, t1 = fold(params['b1'], params['g1'], params['be1'], params['m1'], params['v1'])
    s2, t2 = fold(params['b2'], params['g2'], params['be2'], params['m2'], params['v2'])
    s3, t3 = fold(params['b3'], params['g3'], params['be3'], params['m3'], params['v3'])
    s4, t4 = fold(params['b4'], params['g4'], params['be4'], params['m4'], params['v4'])

    def pad128(v):
        return jnp.pad(v, (0, 128 - v.shape[0]))

    bn_pack = jnp.stack([jnp.tile(s1, 8), jnp.tile(t1, 8),
                         pad128(jnp.tile(s2, 4)), pad128(jnp.tile(t2, 4)),
                         pad128(jnp.tile(s3, 4)), pad128(jnp.tile(t3, 4)),
                         pad128(jnp.tile(s4, 4)), pad128(jnp.tile(t4, 4))], 0)   # (8, 128)

    # ---- fc: one (32, 128) slab per spatial row i, rows in (j, c) lane order --
    fcw = params['fcw'].astype(f32).reshape(128, 8, 4, 4)                  # [n, c, i, j]
    wfc = jnp.transpose(fcw, (2, 3, 1, 0)).reshape(4, 32, 128)             # [i, (j,c), n]
    hv = jnp.stack([params['fcb'].astype(f32), params['fc2w'][0].astype(f32)], 0)  # (2, 128)
    fc2b = params['fc2b'].reshape(1, 1).astype(f32)

    # ---- activation layout plumbing (all in XLA) -----------------------------
    x2d = jnp.mean(x[:, 0], axis=1).astype(f32)                            # (B, 16, 16)
    x2d = jnp.pad(x2d, ((0, b_pad - B), (0, 0), (0, 0)))
    xp = jnp.pad(x2d, ((0, 0), (1, 1), (1, 1)))                            # (b_pad, 18, 18)
    rows = jnp.stack([xp[:, k:k + H, :] for k in range(3)], axis=2)        # (b_pad, 16, 3, 18)
    x1 = rows.reshape(b_pad, H, 54)
    x1 = jnp.pad(x1, ((0, 0), (0, 0), (0, 10)))                            # pad K 54 -> 64
    x1 = x1.reshape(nblk, TB, H, 64).transpose(0, 2, 1, 3).reshape(nblk * H * TB, 64)

    xs = jnp.sum(x[:, 0, :OUT_CHANNELS], axis=1).reshape(B, H * W).astype(f32)
    xs = jnp.pad(xs, ((0, b_pad - B), (0, 0)))                             # (b_pad, 256)

    def fixed(shape):
        return pl.BlockSpec(shape, lambda g: (0,) * len(shape))

    out_flat = pl.pallas_call(
        _fused_kernel(TB),
        out_shape=jax.ShapeDtypeStruct((b_pad, H * W), f32),
        grid=(nblk,),
        in_specs=[
            pl.BlockSpec((H * TB, 64), lambda g: (g, 0)),     # x1: per-block im2col rows
            pl.BlockSpec((TB, H * W), lambda g: (g, 0)),      # xs: channel-summed input
            fixed((64, 256)),                                  # w1_big
            fixed((3, 128, 128)),                              # w2_big
            fixed((3, 64, 32)),                                # w3_big
            fixed((3, 32, 32)),                                # w4_big
            fixed((8, 128)),                                   # packed BN scale/shift
            fixed((4, 32, 128)),                               # fc weight slabs
            fixed((2, 128)),                                   # fc bias / fc2 weight
            fixed((1, 1)),                                     # fc2 bias
        ],
        out_specs=pl.BlockSpec((TB, H * W), lambda g: (g, 0)),
        scratch_shapes=[
            pltpu.VMEM(((H2 + 2) * TB, 128), f32),             # sbuf2: layer-2 input, row-haloed
            pltpu.VMEM(((H4 + 2) * TB, 64), f32),              # sbuf3: layer-3 input, row-haloed
            pltpu.VMEM(((H4 + 2) * TB, 32), f32),              # sbuf4: layer-4 input, row-haloed
        ],
        compiler_params=pltpu.CompilerParams(
            dimension_semantics=("parallel",)),
    )(x1, xs, w1_big, w2_big, w3_big, w4_big, bn_pack, wfc, hv, fc2b)

    return out_flat[:B].reshape(B, H, W)


# --------------------------------------------------------------------------- #
# Pure-JAX reference (mirrors the PyTorch forward, BN in eval mode)
# --------------------------------------------------------------------------- #
def reference_forward(x, p):
    B = x.shape[0]
    x_in = x[:, 0, :OUT_CHANNELS]                # (B, 4, H, W)
    x2d = jnp.mean(x, axis=2)                    # (B, 1, H, W)

    def conv(z, w, b):
        y = lax.conv_general_dilated(z, w, (1, 1), ((1, 1), (1, 1)),
                                     dimension_numbers=('NCHW', 'OIHW', 'NCHW'))
        return y + b[None, :, None, None]

    def bn(z, g, beta, m, v):
        return (z - m[None, :, None, None]) / jnp.sqrt(v[None, :, None, None] + BN_EPS) \
            * g[None, :, None, None] + beta[None, :, None, None]

    def maxpool(z):
        return lax.reduce_window(z, -jnp.inf, lax.max, (1, 1, 2, 2), (1, 1, 2, 2), 'VALID')

    out = jax.nn.relu(bn(maxpool(conv(x2d, p['w1'], p['b1'])), p['g1'], p['be1'], p['m1'], p['v1']))
    out = jax.nn.relu(bn(maxpool(conv(out, p['w2'], p['b2'])), p['g2'], p['be2'], p['m2'], p['v2']))
    out = jax.nn.relu(bn(conv(out, p['w3'], p['b3']), p['g3'], p['be3'], p['m3'], p['v3']))
    out = jax.nn.relu(bn(conv(out, p['w4'], p['b4']), p['g4'], p['be4'], p['m4'], p['v4']))
    flat = out.reshape(B, -1)                    # adaptive pool (4,4) == identity on 4x4
    h = jax.nn.relu(flat @ p['fcw'].T + p['fcb'])
    o = h @ p['fc2w'].T + p['fc2b']              # (B, 1)
    logits = x_in * o[:, :, None, None]          # (B, 4, H, W)
    return jnp.sum(logits, axis=1)


# --------------------------------------------------------------------------- #
# Deterministic synthetic parameters
# --------------------------------------------------------------------------- #
def init_params(key):
    keys = jax.random.split(key, 28)
    it = iter(keys)
    f32 = jnp.float32

    def nrm(shape, scale):
        return scale * jax.random.normal(next(it), shape, f32)

    def bn_params(c):
        g = 1.0 + 0.1 * jax.random.normal(next(it), (c,), f32)
        beta = 0.1 * jax.random.normal(next(it), (c,), f32)
        m = 0.1 * jax.random.normal(next(it), (c,), f32)
        v = jax.random.uniform(next(it), (c,), f32, minval=0.5, maxval=1.5)
        return g, beta, m, v

    p = {}
    p['w1'] = nrm((16, 1, 3, 3), 0.5 / (1 * 9) ** 0.5)
    p['b1'] = nrm((16,), 0.1)
    p['g1'], p['be1'], p['m1'], p['v1'] = bn_params(16)
    p['w2'] = nrm((16, 16, 3, 3), 0.5 / (16 * 9) ** 0.5)
    p['b2'] = nrm((16,), 0.1)
    p['g2'], p['be2'], p['m2'], p['v2'] = bn_params(16)
    p['w3'] = nrm((8, 16, 3, 3), 0.5 / (16 * 9) ** 0.5)
    p['b3'] = nrm((8,), 0.1)
    p['g3'], p['be3'], p['m3'], p['v3'] = bn_params(8)
    p['w4'] = nrm((8, 8, 3, 3), 0.5 / (8 * 9) ** 0.5)
    p['b4'] = nrm((8,), 0.1)
    p['g4'], p['be4'], p['m4'], p['v4'] = bn_params(8)
    p['fcw'] = nrm((128, 128), 0.5 / 128 ** 0.5)
    p['fcb'] = nrm((128,), 0.1)
    p['fc2w'] = nrm((1, 128), 0.5 / 128 ** 0.5)
    p['fc2b'] = nrm((1,), 0.1)
    return p


if __name__ == "__main__":
    key = jax.random.PRNGKey(0)
    k_param, k_x = jax.random.split(key)
    params = init_params(k_param)
    # x: (batch=2, in_channels=1, depth=6, H=16, W=16)
    x = jax.random.normal(k_x, (2, 1, 6, 16, 16), jnp.float32)

    out = jax.jit(powernet_change_forward)(x, params)
    out = jax.block_until_ready(out)
    assert out.shape == (2, 16, 16) and out.dtype == jnp.float32

    ref = reference_forward(x, params)
    max_err = float(jnp.max(jnp.abs(out - ref)))
    if not bool(jnp.allclose(out, ref, rtol=2e-3, atol=2e-3)):
        raise AssertionError(f"Pallas output mismatch vs reference, max abs err = {max_err}")
    print("KERNEL_OK")
</pallas_src>

<mosaic_0001>
module attributes {stable_mosaic.version = 11 : i64} {
  func.func @kernel(%arg0: i32, %arg1: memref<128x64xf32, #tpu.memory_space<vmem>>, %arg2: memref<8x256xf32, #tpu.memory_space<vmem>>, %arg3: memref<64x256xf32, #tpu.memory_space<vmem>>, %arg4: memref<3x128x128xf32, #tpu.memory_space<vmem>>, %arg5: memref<3x64x32xf32, #tpu.memory_space<vmem>>, %arg6: memref<3x32x32xf32, #tpu.memory_space<vmem>>, %arg7: memref<8x128xf32, #tpu.memory_space<vmem>>, %arg8: memref<4x32x128xf32, #tpu.memory_space<vmem>>, %arg9: memref<2x128xf32, #tpu.memory_space<vmem>>, %arg10: memref<1x1xf32, #tpu.memory_space<vmem>>, %arg11: memref<8x256xf32, #tpu.memory_space<vmem>>, %arg12: memref<80x128xf32, #tpu.memory_space<vmem>>, %arg13: memref<48x64xf32, #tpu.memory_space<vmem>>, %arg14: memref<48x32xf32, #tpu.memory_space<vmem>>) attributes {dimension_semantics = [#tpu.dimension_semantics<parallel>], iteration_bounds = array<i64: 1>, scalar_prefetch = 0 : i64, scratch_operands = 3 : i64, tpu.core_type = #tpu.core_type<tc>, window_params = [{transform_indices = @transform_0, window_bounds = array<i64: 128, 64>}, {transform_indices = @transform_1, window_bounds = array<i64: 8, 256>}, {pipeline_mode = #tpu.pipeline_mode<synchronous>, transform_indices = @transform_2, window_bounds = array<i64: 64, 256>}, {pipeline_mode = #tpu.pipeline_mode<synchronous>, transform_indices = @transform_3, window_bounds = array<i64: 3, 128, 128>}, {pipeline_mode = #tpu.pipeline_mode<synchronous>, transform_indices = @transform_4, window_bounds = array<i64: 3, 64, 32>}, {pipeline_mode = #tpu.pipeline_mode<synchronous>, transform_indices = @transform_5, window_bounds = array<i64: 3, 32, 32>}, {pipeline_mode = #tpu.pipeline_mode<synchronous>, transform_indices = @transform_6, window_bounds = array<i64: 8, 128>}, {pipeline_mode = #tpu.pipeline_mode<synchronous>, transform_indices = @transform_7, window_bounds = array<i64: 4, 32, 128>}, {pipeline_mode = #tpu.pipeline_mode<synchronous>, transform_indices = @transform_8, window_bounds = array<i64: 2, 128>}, {pipeline_mode = #tpu.pipeline_mode<synchronous>, transform_indices = @transform_9, window_bounds = array<i64: 1, 1>}, {transform_indices = @transform_10, window_bounds = array<i64: 8, 256>}]} {
    %c0 = arith.constant 0 : index
    %c0_0 = arith.constant 0 : index
    %0 = vector.load %arg1[%c0, %c0_0] : memref<128x64xf32, #tpu.memory_space<vmem>>, vector<128x64xf32>
    %c0_1 = arith.constant 0 : index
    %c0_2 = arith.constant 0 : index
    %1 = vector.load %arg3[%c0_1, %c0_2] : memref<64x256xf32, #tpu.memory_space<vmem>>, vector<64x256xf32>
    %cst = arith.constant dense<0.000000e+00> : vector<128x256xf32>
    %2 = tpu.matmul %0, %1, %cst {dimension_numbers = #tpu.dot_dimension_numbers<[1], [0], [0], [1], [0, 0, 1, 1], [], []>} : vector<128x64xf32>, vector<64x256xf32>, vector<128x256xf32> -> vector<128x256xf32>
    %3 = vector.extract_strided_slice %2 {offsets = [0, 0], sizes = [128, 128], strides = [1, 1]} : vector<128x256xf32> to vector<128x128xf32>
    %4 = vector.extract_strided_slice %2 {offsets = [0, 128], sizes = [128, 128], strides = [1, 1]} : vector<128x256xf32> to vector<128x128xf32>
    %5 = arith.maximumf %3, %4 : vector<128x128xf32>
    %6 = vector.shape_cast %5 : vector<128x128xf32> to vector<8x2x8x128xf32>
    %7 = vector.extract_strided_slice %6 {offsets = [0, 0, 0, 0], sizes = [8, 1, 8, 128], strides = [1, 1, 1, 1]} : vector<8x2x8x128xf32> to vector<8x1x8x128xf32>
    %8 = vector.shape_cast %7 : vector<8x1x8x128xf32> to vector<8x8x128xf32>
    %9 = vector.extract_strided_slice %6 {offsets = [0, 1, 0, 0], sizes = [8, 1, 8, 128], strides = [1, 1, 1, 1]} : vector<8x2x8x128xf32> to vector<8x1x8x128xf32>
    %10 = vector.shape_cast %9 : vector<8x1x8x128xf32> to vector<8x8x128xf32>
    %11 = arith.maximumf %8, %10 : vector<8x8x128xf32>
    %12 = vector.shape_cast %11 : vector<8x8x128xf32> to vector<64x128xf32>
    %c0_3 = arith.constant 0 : index
    %c0_4 = arith.constant 0 : index
    %13 = vector.load %arg7[%c0_3, %c0_4] : memref<8x128xf32, #tpu.memory_space<vmem>>, vector<1x128xf32>
    %14 = vector.broadcast %13 : vector<1x128xf32> to vector<64x128xf32>
    %15 = arith.mulf %12, %14 : vector<64x128xf32>
    %c1 = arith.constant 1 : index
    %c0_5 = arith.constant 0 : index
    %16 = vector.load %arg7[%c1, %c0_5] : memref<8x128xf32, #tpu.memory_space<vmem>>, vector<1x128xf32>
    %17 = vector.broadcast %16 : vector<1x128xf32> to vector<64x128xf32>
    %18 = arith.addf %15, %17 : vector<64x128xf32>
    %cst_6 = arith.constant 0.000000e+00 : f32
    %19 = vector.broadcast %cst_6 : f32 to vector<64x128xf32>
    %20 = arith.maximumf %18, %19 : vector<64x128xf32>
    %cst_7 = arith.constant 0.000000e+00 : f32
    %21 = vector.broadcast %cst_7 : f32 to vector<8x128xf32>
    %c0_8 = arith.constant 0 : index
    %c0_9 = arith.constant 0 : index
    %22 = vector.load %arg12[%c0_8, %c0_9] : memref<80x128xf32, #tpu.memory_space<vmem>>, vector<8x128xf32>
    tpu.vector_store %arg12[%c0_8, %c0_9], %21 {strides = array<i32>} : memref<80x128xf32, #tpu.memory_space<vmem>>, vector<8x128xf32>,
    %cst_10 = arith.constant 0.000000e+00 : f32
    %23 = vector.broadcast %cst_10 : f32 to vector<8x128xf32>
    %c72 = arith.constant 72 : index
    %c0_11 = arith.constant 0 : index
    %24 = vector.load %arg12[%c72, %c0_11] : memref<80x128xf32, #tpu.memory_space<vmem>>, vector<8x128xf32>
    tpu.vector_store %arg12[%c72, %c0_11], %23 {strides = array<i32>} : memref<80x128xf32, #tpu.memory_space<vmem>>, vector<8x128xf32>,
    %c8 = arith.constant 8 : index
    %c0_12 = arith.constant 0 : index
    %25 = vector.load %arg12[%c8, %c0_12] : memref<80x128xf32, #tpu.memory_space<vmem>>, vector<64x128xf32>
    tpu.vector_store %arg12[%c8, %c0_12], %20 {strides = array<i32>} : memref<80x128xf32, #tpu.memory_space<vmem>>, vector<64x128xf32>,
    %cst_13 = arith.constant 0.000000e+00 : f32
    %26 = vector.broadcast %cst_13 : f32 to vector<64x128xf32>
    %c0_14 = arith.constant 0 : index
    %c0_15 = arith.constant 0 : index
    %27 = vector.load %arg12[%c0_14, %c0_15] : memref<80x128xf32, #tpu.memory_space<vmem>>, vector<64x128xf32>
    %c0_16 = arith.constant 0 : index
    %c0_17 = arith.constant 0 : index
    %c0_18 = arith.constant 0 : index
    %28 = vector.load %arg4[%c0_16, %c0_17, %c0_18] : memref<3x128x128xf32, #tpu.memory_space<vmem>>, vector<1x128x128xf32>
    %29 = vector.shape_cast %28 : vector<1x128x128xf32> to vector<128x128xf32>
    %cst_19 = arith.constant dense<0.000000e+00> : vector<64x128xf32>
    %30 = tpu.matmul %27, %29, %cst_19 {dimension_numbers = #tpu.dot_dimension_numbers<[1], [0], [0], [1], [0, 0, 1, 1], [], []>} : vector<64x128xf32>, vector<128x128xf32>, vector<64x128xf32> -> vector<64x128xf32>
    %31 = arith.addf %26, %30 : vector<64x128xf32>
    %c8_20 = arith.constant 8 : index
    %c0_21 = arith.constant 0 : index
    %32 = vector.load %arg12[%c8_20, %c0_21] : memref<80x128xf32, #tpu.memory_space<vmem>>, vector<64x128xf32>
    %c1_22 = arith.constant 1 : index
    %c0_23 = arith.constant 0 : index
    %c0_24 = arith.constant 0 : index
    %33 = vector.load %arg4[%c1_22, %c0_23, %c0_24] : memref<3x128x128xf32, #tpu.memory_space<vmem>>, vector<1x128x128xf32>
    %34 = vector.shape_cast %33 : vector<1x128x128xf32> to vector<128x128xf32>
    %cst_25 = arith.constant dense<0.000000e+00> : vector<64x128xf32>
    %35 = tpu.matmul %32, %34, %cst_25 {dimension_numbers = #tpu.dot_dimension_numbers<[1], [0], [0], [1], [0, 0, 1, 1], [], []>} : vector<64x128xf32>, vector<128x128xf32>, vector<64x128xf32> -> vector<64x128xf32>
    %36 = arith.addf %31, %35 : vector<64x128xf32>
    %c16 = arith.constant 16 : index
    %c0_26 = arith.constant 0 : index
    %37 = vector.load %arg12[%c16, %c0_26] : memref<80x128xf32, #tpu.memory_space<vmem>>, vector<64x128xf32>
    %c2 = arith.constant 2 : index
    %c0_27 = arith.constant 0 : index
    %c0_28 = arith.constant 0 : index
    %38 = vector.load %arg4[%c2, %c0_27, %c0_28] : memref<3x128x128xf32, #tpu.memory_space<vmem>>, vector<1x128x128xf32>
    %39 = vector.shape_cast %38 : vector<1x128x128xf32> to vector<128x128xf32>
    %cst_29 = arith.constant dense<0.000000e+00> : vector<64x128xf32>
    %40 = tpu.matmul %37, %39, %cst_29 {dimension_numbers = #tpu.dot_dimension_numbers<[1], [0], [0], [1], [0, 0, 1, 1], [], []>} : vector<64x128xf32>, vector<128x128xf32>, vector<64x128xf32> -> vector<64x128xf32>
    %41 = arith.addf %36, %40 : vector<64x128xf32>
    %42 = vector.shape_cast %41 : vector<64x128xf32> to vector<4x2x8x128xf32>
    %43 = vector.extract_strided_slice %42 {offsets = [0, 0, 0, 0], sizes = [4, 1, 8, 128], strides = [1, 1, 1, 1]} : vector<4x2x8x128xf32> to vector<4x1x8x128xf32>
    %44 = vector.shape_cast %43 : vector<4x1x8x128xf32> to vector<4x8x128xf32>
    %45 = vector.extract_strided_slice %42 {offsets = [0, 1, 0, 0], sizes = [4, 1, 8, 128], strides = [1, 1, 1, 1]} : vector<4x2x8x128xf32> to vector<4x1x8x128xf32>
    %46 = vector.shape_cast %45 : vector<4x1x8x128xf32> to vector<4x8x128xf32>
    %47 = arith.maximumf %44, %46 : vector<4x8x128xf32>
    %48 = vector.shape_cast %47 : vector<4x8x128xf32> to vector<32x128xf32>
    %49 = vector.extract_strided_slice %48 {offsets = [0, 0], sizes = [32, 64], strides = [1, 1]} : vector<32x128xf32> to vector<32x64xf32>
    %50 = vector.extract_strided_slice %48 {offsets = [0, 64], sizes = [32, 64], strides = [1, 1]} : vector<32x128xf32> to vector<32x64xf32>
    %51 = arith.maximumf %49, %50 : vector<32x64xf32>
    %c2_30 = arith.constant 2 : index
    %c0_31 = arith.constant 0 : index
    %52 = vector.load %arg7[%c2_30, %c0_31] : memref<8x128xf32, #tpu.memory_space<vmem>>, vector<1x64xf32>
    %53 = vector.broadcast %52 : vector<1x64xf32> to vector<32x64xf32>
    %54 = arith.mulf %51, %53 : vector<32x64xf32>
    %c3 = arith.constant 3 : index
    %c0_32 = arith.constant 0 : index
    %55 = vector.load %arg7[%c3, %c0_32] : memref<8x128xf32, #tpu.memory_space<vmem>>, vector<1x64xf32>
    %56 = vector.broadcast %55 : vector<1x64xf32> to vector<32x64xf32>
    %57 = arith.addf %54, %56 : vector<32x64xf32>
    %cst_33 = arith.constant 0.000000e+00 : f32
    %58 = vector.broadcast %cst_33 : f32 to vector<32x64xf32>
    %59 = arith.maximumf %57, %58 : vector<32x64xf32>
    %cst_34 = arith.constant 0.000000e+00 : f32
    %60 = vector.broadcast %cst_34 : f32 to vector<8x64xf32>
    %c0_35 = arith.constant 0 : index
    %c0_36 = arith.constant 0 : index
    %61 = vector.load %arg13[%c0_35, %c0_36] : memref<48x64xf32, #tpu.memory_space<vmem>>, vector<8x64xf32>
    tpu.vector_store %arg13[%c0_35, %c0_36], %60 {strides = array<i32>} : memref<48x64xf32, #tpu.memory_space<vmem>>, vector<8x64xf32>,
    %cst_37 = arith.constant 0.000000e+00 : f32
    %62 = vector.broadcast %cst_37 : f32 to vector<8x64xf32>
    %c40 = arith.constant 40 : index
    %c0_38 = arith.constant 0 : index
    %63 = vector.load %arg13[%c40, %c0_38] : memref<48x64xf32, #tpu.memory_space<vmem>>, vector<8x64xf32>
    tpu.vector_store %arg13[%c40, %c0_38], %62 {strides = array<i32>} : memref<48x64xf32, #tpu.memory_space<vmem>>, vector<8x64xf32>,
    %c8_39 = arith.constant 8 : index
    %c0_40 = arith.constant 0 : index
    %64 = vector.load %arg13[%c8_39, %c0_40] : memref<48x64xf32, #tpu.memory_space<vmem>>, vector<32x64xf32>
    tpu.vector_store %arg13[%c8_39, %c0_40], %59 {strides = array<i32>} : memref<48x64xf32, #tpu.memory_space<vmem>>, vector<32x64xf32>,
    %cst_41 = arith.constant 0.000000e+00 : f32
    %65 = vector.broadcast %cst_41 : f32 to vector<32x32xf32>
    %c0_42 = arith.constant 0 : index
    %c0_43 = arith.constant 0 : index
    %66 = vector.load %arg13[%c0_42, %c0_43] : memref<48x64xf32, #tpu.memory_space<vmem>>, vector<32x64xf32>
    %c0_44 = arith.constant 0 : index
    %c0_45 = arith.constant 0 : index
    %c0_46 = arith.constant 0 : index
    %67 = vector.load %arg5[%c0_44, %c0_45, %c0_46] : memref<3x64x32xf32, #tpu.memory_space<vmem>>, vector<1x64x32xf32>
    %68 = vector.shape_cast %67 : vector<1x64x32xf32> to vector<64x32xf32>
    %cst_47 = arith.constant dense<0.000000e+00> : vector<32x32xf32>
    %69 = tpu.matmul %66, %68, %cst_47 {dimension_numbers = #tpu.dot_dimension_numbers<[1], [0], [0], [1], [0, 0, 1, 1], [], []>} : vector<32x64xf32>, vector<64x32xf32>, vector<32x32xf32> -> vector<32x32xf32>
    %70 = arith.addf %65, %69 : vector<32x32xf32>
    %c8_48 = arith.constant 8 : index
    %c0_49 = arith.constant 0 : index
    %71 = vector.load %arg13[%c8_48, %c0_49] : memref<48x64xf32, #tpu.memory_space<vmem>>, vector<32x64xf32>
    %c1_50 = arith.constant 1 : index
    %c0_51 = arith.constant 0 : index
    %c0_52 = arith.constant 0 : index
    %72 = vector.load %arg5[%c1_50, %c0_51, %c0_52] : memref<3x64x32xf32, #tpu.memory_space<vmem>>, vector<1x64x32xf32>
    %73 = vector.shape_cast %72 : vector<1x64x32xf32> to vector<64x32xf32>
    %cst_53 = arith.constant dense<0.000000e+00> : vector<32x32xf32>
    %74 = tpu.matmul %71, %73, %cst_53 {dimension_numbers = #tpu.dot_dimension_numbers<[1], [0], [0], [1], [0, 0, 1, 1], [], []>} : vector<32x64xf32>, vector<64x32xf32>, vector<32x32xf32> -> vector<32x32xf32>
    %75 = arith.addf %70, %74 : vector<32x32xf32>
    %c16_54 = arith.constant 16 : index
    %c0_55 = arith.constant 0 : index
    %76 = vector.load %arg13[%c16_54, %c0_55] : memref<48x64xf32, #tpu.memory_space<vmem>>, vector<32x64xf32>
    %c2_56 = arith.constant 2 : index
    %c0_57 = arith.constant 0 : index
    %c0_58 = arith.constant 0 : index
    %77 = vector.load %arg5[%c2_56, %c0_57, %c0_58] : memref<3x64x32xf32, #tpu.memory_space<vmem>>, vector<1x64x32xf32>
    %78 = vector.shape_cast %77 : vector<1x64x32xf32> to vector<64x32xf32>
    %cst_59 = arith.constant dense<0.000000e+00> : vector<32x32xf32>
    %79 = tpu.matmul %76, %78, %cst_59 {dimension_numbers = #tpu.dot_dimension_numbers<[1], [0], [0], [1], [0, 0, 1, 1], [], []>} : vector<32x64xf32>, vector<64x32xf32>, vector<32x32xf32> -> vector<32x32xf32>
    %80 = arith.addf %75, %79 : vector<32x32xf32>
    %c4 = arith.constant 4 : index
    %c0_60 = arith.constant 0 : index
    %81 = vector.load %arg7[%c4, %c0_60] : memref<8x128xf32, #tpu.memory_space<vmem>>, vector<1x32xf32>
    %82 = vector.broadcast %81 : vector<1x32xf32> to vector<32x32xf32>
    %83 = arith.mulf %80, %82 : vector<32x32xf32>
    %c5 = arith.constant 5 : index
    %c0_61 = arith.constant 0 : index
    %84 = vector.load %arg7[%c5, %c0_61] : memref<8x128xf32, #tpu.memory_space<vmem>>, vector<1x32xf32>
    %85 = vector.broadcast %84 : vector<1x32xf32> to vector<32x32xf32>
    %86 = arith.addf %83, %85 : vector<32x32xf32>
    %cst_62 = arith.constant 0.000000e+00 : f32
    %87 = vector.broadcast %cst_62 : f32 to vector<32x32xf32>
    %88 = arith.maximumf %86, %87 : vector<32x32xf32>
    %cst_63 = arith.constant 0.000000e+00 : f32
    %89 = vector.broadcast %cst_63 : f32 to vector<8x32xf32>
    %c0_64 = arith.constant 0 : index
    %c0_65 = arith.constant 0 : index
    %90 = vector.load %arg14[%c0_64, %c0_65] : memref<48x32xf32, #tpu.memory_space<vmem>>, vector<8x32xf32>
    tpu.vector_store %arg14[%c0_64, %c0_65], %89 {strides = array<i32>} : memref<48x32xf32, #tpu.memory_space<vmem>>, vector<8x32xf32>,
    %cst_66 = arith.constant 0.000000e+00 : f32
    %91 = vector.broadcast %cst_66 : f32 to vector<8x32xf32>
    %c40_67 = arith.constant 40 : index
    %c0_68 = arith.constant 0 : index
    %92 = vector.load %arg14[%c40_67, %c0_68] : memref<48x32xf32, #tpu.memory_space<vmem>>, vector<8x32xf32>
    tpu.vector_store %arg14[%c40_67, %c0_68], %91 {strides = array<i32>} : memref<48x32xf32, #tpu.memory_space<vmem>>, vector<8x32xf32>,
    %c8_69 = arith.constant 8 : index
    %c0_70 = arith.constant 0 : index
    %93 = vector.load %arg14[%c8_69, %c0_70] : memref<48x32xf32, #tpu.memory_space<vmem>>, vector<32x32xf32>
    tpu.vector_store %arg14[%c8_69, %c0_70], %88 {strides = array<i32>} : memref<48x32xf32, #tpu.memory_space<vmem>>, vector<32x32xf32>,
    %cst_71 = arith.constant 0.000000e+00 : f32
    %94 = vector.broadcast %cst_71 : f32 to vector<32x32xf32>
    %c0_72 = arith.constant 0 : index
    %c0_73 = arith.constant 0 : index
    %95 = vector.load %arg14[%c0_72, %c0_73] : memref<48x32xf32, #tpu.memory_space<vmem>>, vector<32x32xf32>
    %c0_74 = arith.constant 0 : index
    %c0_75 = arith.constant 0 : index
    %c0_76 = arith.constant 0 : index
    %96 = vector.load %arg6[%c0_74, %c0_75, %c0_76] : memref<3x32x32xf32, #tpu.memory_space<vmem>>, vector<1x32x32xf32>
    %97 = vector.shape_cast %96 : vector<1x32x32xf32> to vector<32x32xf32>
    %cst_77 = arith.constant dense<0.000000e+00> : vector<32x32xf32>
    %98 = tpu.matmul %95, %97, %cst_77 {dimension_numbers = #tpu.dot_dimension_numbers<[1], [0], [0], [1], [0, 0, 1, 1], [], []>} : vector<32x32xf32>, vector<32x32xf32>, vector<32x32xf32> -> vector<32x32xf32>
    %99 = arith.addf %94, %98 : vector<32x32xf32>
    %c8_78 = arith.constant 8 : index
    %c0_79 = arith.constant 0 : index
    %100 = vector.load %arg14[%c8_78, %c0_79] : memref<48x32xf32, #tpu.memory_space<vmem>>, vector<32x32xf32>
    %c1_80 = arith.constant 1 : index
    %c0_81 = arith.constant 0 : index
    %c0_82 = arith.constant 0 : index
    %101 = vector.load %arg6[%c1_80, %c0_81, %c0_82] : memref<3x32x32xf32, #tpu.memory_space<vmem>>, vector<1x32x32xf32>
    %102 = vector.shape_cast %101 : vector<1x32x32xf32> to vector<32x32xf32>
    %cst_83 = arith.constant dense<0.000000e+00> : vector<32x32xf32>
    %103 = tpu.matmul %100, %102, %cst_83 {dimension_numbers = #tpu.dot_dimension_numbers<[1], [0], [0], [1], [0, 0, 1, 1], [], []>} : vector<32x32xf32>, vector<32x32xf32>, vector<32x32xf32> -> vector<32x32xf32>
    %104 = arith.addf %99, %103 : vector<32x32xf32>
    %c16_84 = arith.constant 16 : index
    %c0_85 = arith.constant 0 : index
    %105 = vector.load %arg14[%c16_84, %c0_85] : memref<48x32xf32, #tpu.memory_space<vmem>>, vector<32x32xf32>
    %c2_86 = arith.constant 2 : index
    %c0_87 = arith.constant 0 : index
    %c0_88 = arith.constant 0 : index
    %106 = vector.load %arg6[%c2_86, %c0_87, %c0_88] : memref<3x32x32xf32, #tpu.memory_space<vmem>>, vector<1x32x32xf32>
    %107 = vector.shape_cast %106 : vector<1x32x32xf32> to vector<32x32xf32>
    %cst_89 = arith.constant dense<0.000000e+00> : vector<32x32xf32>
    %108 = tpu.matmul %105, %107, %cst_89 {dimension_numbers = #tpu.dot_dimension_numbers<[1], [0], [0], [1], [0, 0, 1, 1], [], []>} : vector<32x32xf32>, vector<32x32xf32>, vector<32x32xf32> -> vector<32x32xf32>
    %109 = arith.addf %104, %108 : vector<32x32xf32>
    %c6 = arith.constant 6 : index
    %c0_90 = arith.constant 0 : index
    %110 = vector.load %arg7[%c6, %c0_90] : memref<8x128xf32, #tpu.memory_space<vmem>>, vector<1x32xf32>
    %111 = vector.broadcast %110 : vector<1x32xf32> to vector<32x32xf32>
    %112 = arith.mulf %109, %111 : vector<32x32xf32>
    %c7 = arith.constant 7 : index
    %c0_91 = arith.constant 0 : index
    %113 = vector.load %arg7[%c7, %c0_91] : memref<8x128xf32, #tpu.memory_space<vmem>>, vector<1x32xf32>
    %114 = vector.broadcast %113 : vector<1x32xf32> to vector<32x32xf32>
    %115 = arith.addf %112, %114 : vector<32x32xf32>
    %cst_92 = arith.constant 0.000000e+00 : f32
    %116 = vector.broadcast %cst_92 : f32 to vector<32x32xf32>
    %117 = arith.maximumf %115, %116 : vector<32x32xf32>
    %118 = vector.extract_strided_slice %117 {offsets = [0, 0], sizes = [8, 32], strides = [1, 1]} : vector<32x32xf32> to vector<8x32xf32>
    %c0_93 = arith.constant 0 : index
    %c0_94 = arith.constant 0 : index
    %c0_95 = arith.constant 0 : index
    %119 = vector.load %arg8[%c0_93, %c0_94, %c0_95] : memref<4x32x128xf32, #tpu.memory_space<vmem>>, vector<1x32x128xf32>
    %120 = vector.shape_cast %119 : vector<1x32x128xf32> to vector<32x128xf32>
    %cst_96 = arith.constant dense<0.000000e+00> : vector<8x128xf32>
    %121 = tpu.matmul %118, %120, %cst_96 {dimension_numbers = #tpu.dot_dimension_numbers<[1], [0], [0], [1], [0, 0, 1, 1], [], []>} : vector<8x32xf32>, vector<32x128xf32>, vector<8x128xf32> -> vector<8x128xf32>
    %122 = vector.extract_strided_slice %117 {offsets = [8, 0], sizes = [8, 32], strides = [1, 1]} : vector<32x32xf32> to vector<8x32xf32>
    %c1_97 = arith.constant 1 : index
    %c0_98 = arith.constant 0 : index
    %c0_99 = arith.constant 0 : index
    %123 = vector.load %arg8[%c1_97, %c0_98, %c0_99] : memref<4x32x128xf32, #tpu.memory_space<vmem>>, vector<1x32x128xf32>
    %124 = vector.shape_cast %123 : vector<1x32x128xf32> to vector<32x128xf32>
    %cst_100 = arith.constant dense<0.000000e+00> : vector<8x128xf32>
    %125 = tpu.matmul %122, %124, %cst_100 {dimension_numbers = #tpu.dot_dimension_numbers<[1], [0], [0], [1], [0, 0, 1, 1], [], []>} : vector<8x32xf32>, vector<32x128xf32>, vector<8x128xf32> -> vector<8x128xf32>
    %126 = arith.addf %121, %125 : vector<8x128xf32>
    %127 = vector.extract_strided_slice %117 {offsets = [16, 0], sizes = [8, 32], strides = [1, 1]} : vector<32x32xf32> to vector<8x32xf32>
    %c2_101 = arith.constant 2 : index
    %c0_102 = arith.constant 0 : index
    %c0_103 = arith.constant 0 : index
    %128 = vector.load %arg8[%c2_101, %c0_102, %c0_103] : memref<4x32x128xf32, #tpu.memory_space<vmem>>, vector<1x32x128xf32>
    %129 = vector.shape_cast %128 : vector<1x32x128xf32> to vector<32x128xf32>
    %cst_104 = arith.constant dense<0.000000e+00> : vector<8x128xf32>
    %130 = tpu.matmul %127, %129, %cst_104 {dimension_numbers = #tpu.dot_dimension_numbers<[1], [0], [0], [1], [0, 0, 1, 1], [], []>} : vector<8x32xf32>, vector<32x128xf32>, vector<8x128xf32> -> vector<8x128xf32>
    %131 = arith.addf %126, %130 : vector<8x128xf32>
    %132 = vector.extract_strided_slice %117 {offsets = [24, 0], sizes = [8, 32], strides = [1, 1]} : vector<32x32xf32> to vector<8x32xf32>
    %c3_105 = arith.constant 3 : index
    %c0_106 = arith.constant 0 : index
    %c0_107 = arith.constant 0 : index
    %133 = vector.load %arg8[%c3_105, %c0_106, %c0_107] : memref<4x32x128xf32, #tpu.memory_space<vmem>>, vector<1x32x128xf32>
    %134 = vector.shape_cast %133 : vector<1x32x128xf32> to vector<32x128xf32>
    %cst_108 = arith.constant dense<0.000000e+00> : vector<8x128xf32>
    %135 = tpu.matmul %132, %134, %cst_108 {dimension_numbers = #tpu.dot_dimension_numbers<[1], [0], [0], [1], [0, 0, 1, 1], [], []>} : vector<8x32xf32>, vector<32x128xf32>, vector<8x128xf32> -> vector<8x128xf32>
    %136 = arith.addf %131, %135 : vector<8x128xf32>
    %c0_109 = arith.constant 0 : index
    %c0_110 = arith.constant 0 : index
    %137 = vector.load %arg9[%c0_109, %c0_110] : memref<2x128xf32, #tpu.memory_space<vmem>>, vector<1x128xf32>
    %138 = vector.broadcast %137 : vector<1x128xf32> to vector<8x128xf32>
    %139 = arith.addf %136, %138 : vector<8x128xf32>
    %cst_111 = arith.constant 0.000000e+00 : f32
    %140 = vector.broadcast %cst_111 : f32 to vector<8x128xf32>
    %141 = arith.maximumf %139, %140 : vector<8x128xf32>
    %c1_112 = arith.constant 1 : index
    %c0_113 = arith.constant 0 : index
    %142 = vector.load %arg9[%c1_112, %c0_113] : memref<2x128xf32, #tpu.memory_space<vmem>>, vector<1x128xf32>
    %143 = vector.broadcast %142 : vector<1x128xf32> to vector<8x128xf32>
    %144 = arith.mulf %141, %143 : vector<8x128xf32>
    %cst_114 = arith.constant dense<0.000000e+00> : vector<8xf32>
    %145 = vector.multi_reduction <add>, %144, %cst_114 [1] : vector<8x128xf32> to vector<8xf32>
    %146 = vector.shape_cast %145 : vector<8xf32> to vector<8x1xf32>
    %c0_115 = arith.constant 0 : index
    %c0_116 = arith.constant 0 : index
    %147 = vector.load %arg10[%c0_115, %c0_116] : memref<1x1xf32, #tpu.memory_space<vmem>>, vector<1x1xf32>
    %148 = vector.broadcast %147 : vector<1x1xf32> to vector<8x1xf32>
    %149 = arith.addf %146, %148 : vector<8x1xf32>
    %c0_117 = arith.constant 0 : index
    %c0_118 = arith.constant 0 : index
    %150 = vector.load %arg2[%c0_117, %c0_118] : memref<8x256xf32, #tpu.memory_space<vmem>>, vector<8x256xf32>
    %151 = vector.broadcast %149 : vector<8x1xf32> to vector<8x256xf32>
    %152 = arith.mulf %150, %151 : vector<8x256xf32>
    %c0_119 = arith.constant 0 : index
    %c0_120 = arith.constant 0 : index
    %153 = vector.load %arg11[%c0_119, %c0_120] : memref<8x256xf32, #tpu.memory_space<vmem>>, vector<8x256xf32>
    tpu.vector_store %arg11[%c0_119, %c0_120], %152 {strides = array<i32>} : memref<8x256xf32, #tpu.memory_space<vmem>>, vector<8x256xf32>,
    return
  }
  func.func @transform_0(%arg0: i32) -> (i32, i32) {
    %c0_i32 = arith.constant 0 : i32
    %c0_i32_0 = arith.constant 0 : i32
    return %arg0, %c0_i32 : i32, i32
  }
  func.func @transform_1(%arg0: i32) -> (i32, i32) {
    %c0_i32 = arith.constant 0 : i32
    %c0_i32_0 = arith.constant 0 : i32
    return %arg0, %c0_i32 : i32, i32
  }
  func.func @transform_2(%arg0: i32) -> (i32, i32) {
    %c0_i32 = arith.constant 0 : i32
    %c0_i32_0 = arith.constant 0 : i32
    %c0_i32_1 = arith.constant 0 : i32
    return %c0_i32, %c0_i32_0 : i32, i32
  }
  func.func @transform_3(%arg0: i32) -> (i32, i32, i32) {
    %c0_i32 = arith.constant 0 : i32
    %c0_i32_0 = arith.constant 0 : i32
    %c0_i32_1 = arith.constant 0 : i32
    %c0_i32_2 = arith.constant 0 : i32
    return %c0_i32, %c0_i32_0, %c0_i32_1 : i32, i32, i32
  }
  func.func @transform_4(%arg0: i32) -> (i32, i32, i32) {
    %c0_i32 = arith.constant 0 : i32
    %c0_i32_0 = arith.constant 0 : i32
    %c0_i32_1 = arith.constant 0 : i32
    %c0_i32_2 = arith.constant 0 : i32
    return %c0_i32, %c0_i32_0, %c0_i32_1 : i32, i32, i32
  }
  func.func @transform_5(%arg0: i32) -> (i32, i32, i32) {
    %c0_i32 = arith.constant 0 : i32
    %c0_i32_0 = arith.constant 0 : i32
    %c0_i32_1 = arith.constant 0 : i32
    %c0_i32_2 = arith.constant 0 : i32
    return %c0_i32, %c0_i32_0, %c0_i32_1 : i32, i32, i32
  }
  func.func @transform_6(%arg0: i32) -> (i32, i32) {
    %c0_i32 = arith.constant 0 : i32
    %c0_i32_0 = arith.constant 0 : i32
    %c0_i32_1 = arith.constant 0 : i32
    return %c0_i32, %c0_i32_0 : i32, i32
  }
  func.func @transform_7(%arg0: i32) -> (i32, i32, i32) {
    %c0_i32 = arith.constant 0 : i32
    %c0_i32_0 = arith.constant 0 : i32
    %c0_i32_1 = arith.constant 0 : i32
    %c0_i32_2 = arith.constant 0 : i32
    return %c0_i32, %c0_i32_0, %c0_i32_1 : i32, i32, i32
  }
  func.func @transform_8(%arg0: i32) -> (i32, i32) {
    %c0_i32 = arith.constant 0 : i32
    %c0_i32_0 = arith.constant 0 : i32
    %c0_i32_1 = arith.constant 0 : i32
    return %c0_i32, %c0_i32_0 : i32, i32
  }
  func.func @transform_9(%arg0: i32) -> (i32, i32) {
    %c0_i32 = arith.constant 0 : i32
    %c0_i32_0 = arith.constant 0 : i32
    %c0_i32_1 = arith.constant 0 : i32
    return %c0_i32, %c0_i32_0 : i32, i32
  }
  func.func @transform_10(%arg0: i32) -> (i32, i32) {
    %c0_i32 = arith.constant 0 : i32
    %c0_i32_0 = arith.constant 0 : i32
    return %arg0, %c0_i32 : i32, i32
  }
}

</mosaic_0001>

<bundles_post_ra>
// kernel: tile.43
= control target key start
LH: loop header
LB: loop body
LE: loop exit
PB: predicated region body
PF: predicated region fallthrough
CT: control target
= control target key end

     0   :  { %s22_s0 = inlined_call_operand.vmem [shape: f32[16], index: 0, kind: input, shape index: {}]   ;;  %s23_s1 = inlined_call_operand.vmem [shape: f32[8,16], index: 1, kind: output, shape index: {}]  }
   0x1   :  { %v4_v0 = vld [vmem:[%s22_s0] ss:$0 sm:$0xff] }
   0x2   :  { %5 = vst [vmem:[%s23_s1] sm:$0xff] %v4_v0 }

// kernel: tile.78
= control target key start
LH: loop header
LB: loop body
LE: loop exit
PB: predicated region body
PF: predicated region fallthrough
CT: control target
= control target key end

     0   :  { %s67_s10 = smov 112   ;;  %s68_s11 = smov 80   ;;  %vm3_vm0 = vcmask 130048   ;;  %vm9_vm1 = vcmask 1048448   ;;  %vm15_vm2 = vcmask 917248   ;;  %vm21_vm3 = vcmask 786048   ;;  %s111_s0 = inlined_call_operand.vmem [shape: f32[8,16], index: 0, kind: input, shape index: {}]   ;;  %s112_s1 = inlined_call_operand.vmem [shape: f32[1,128], index: 1, kind: output, shape index: {}]  }
   0x1   :  { %v53_v0 = vld [vmem:[%s111_s0 + $0x7] sm:$0x1]   ;;  %v55_v1 = vld [vmem:[%s111_s0 + $0x5] sm:$0x1]   ;;  %v57_v2 = vld [vmem:[%s111_s0 + $0x3] sm:$0x1]  }
   0x2   :  { %7 = vrot.lane.b32.xlu0 %v53_v0, %s67_s10  ;;  %19 = vrot.lane.b32.xlu1 %v55_v1, %s68_s11  ;;  %s69_s14 = smov 48   ;;  %v54_v3 = vld [vmem:[%s111_s0 + $0x6] sm:$0x1]   ;;  %v56_v4 = vld [vmem:[%s111_s0 + $0x4] sm:$0x1]   ;;  %s70_s21 = smov 96  }
   0x3   :  { %31 = vrot.lane.b32.xlu2 %v57_v2, %s69_s14  ;;  %v58_v5 = vld [vmem:[%s111_s0 + $0x2] sm:$0x1]   ;;  %s71_s22 = smov 64   ;;  %s72_s23 = smov 32   ;;  %v59_v6 = vld [vmem:[%s111_s0 + $0x1] sm:$0x1]  }
   0x4   :  { %s73_s26 = smov 16   ;;  %v2_v7 = vld [vmem:[%s111_s0] sm:$0x1]   ;;  %vm27_vm4 = vcmask 654848   ;;  %vm33_vm5 = vcmask 523648   ;;  %vm39_vm6 = vcmask 392448  }
   0x5   :  { %4 = vst.msk [vmem:[#allocation0] sm:$0x1] %vm3_vm0, %v2_v7   ;;  %vm45_vm7 = vcmask 261248  }
   0xa   :  { %13 = vrot.lane.b32.xlu0 %v54_v3, %s70_s21  ;;  %25 = vrot.lane.b32.xlu1 %v56_v4, %s71_s22 }
   0xb   :  { %37 = vrot.lane.b32.xlu2 %v58_v5, %s72_s23 }
  0x12   :  { %43 = vrot.lane.b32.xlu0 %v59_v6, %s73_s26 }
  0x5d   :  { %v32_v8 = vpop.permute.xlu2 %31  }
  0x65   :  { %v38_v9 = vpop.permute.xlu2 %37  }
  0x74   :  { %v8_v10 = vpop.permute.xlu0 %7   ;;  %v20_v11 = vpop.permute.xlu1 %19  }
  0x75   :  { %10 = vst.msk [vmem:[#allocation0] sm:$0x1] %vm9_vm1, %v8_v10  }
  0x7c   :  { %v14_v12 = vpop.permute.xlu0 %13   ;;  %v26_v13 = vpop.permute.xlu1 %25  }
  0x7d   :  { %16 = vst.msk [vmem:[#allocation0] sm:$0x1] %vm15_vm2, %v14_v12  }
  0x7e   :  { %22 = vst.msk [vmem:[#allocation0] sm:$0x1] %vm21_vm3, %v20_v11  }
  0x7f   :  { %28 = vst.msk [vmem:[#allocation0] sm:$0x1] %vm27_vm4, %v26_v13  }
  0x80   :  { %34 = vst.msk [vmem:[#allocation0] sm:$0x1] %vm33_vm5, %v32_v8  }
  0x81   :  { %40 = vst.msk [vmem:[#allocation0] sm:$0x1] %vm39_vm6, %v38_v9  }
  0x84   :  { %v44_v14 = vpop.permute.xlu0 %43  }
  0x85   :  { %46 = vst.msk [vmem:[#allocation0] sm:$0x1] %vm45_vm7, %v44_v14  }
  0x8c   :  { %v49_v15 = vld [vmem:[#allocation0] sm:$0x1] }
  0x8d   :  { %52 = vst [vmem:[%s112_s1] sm:$0x1] %v49_v15 }

// kernel: tile.51
= control target key start
LH: loop header
LB: loop body
LE: loop exit
PB: predicated region body
PF: predicated region fallthrough
CT: control target
= control target key end

     0   :  { %s22_s0 = inlined_call_operand.vmem [shape: f32[16], index: 0, kind: input, shape index: {}]   ;;  %s23_s1 = inlined_call_operand.vmem [shape: f32[4,16], index: 1, kind: output, shape index: {}]  }
   0x1   :  { %v4_v0 = vld [vmem:[%s22_s0] ss:$0 sm:$0xff] }
   0x2   :  { %5 = vst [vmem:[%s23_s1] sm:$0xf] %v4_v0 }

// kernel: tile.52
= control target key start
LH: loop header
LB: loop body
LE: loop exit
PB: predicated region body
PF: predicated region fallthrough
CT: control target
= control target key end

     0   :  { %s37_s8 = smov 16   ;;  %s38_s9 = smov 32   ;;  %vm7_vm0 = vcmask 130048   ;;  %vm13_vm1 = vcmask 523648   ;;  %vm19_vm2 = vcmask 392448   ;;  %vm25_vm3 = vcmask 261248   ;;  %s55_s0 = inlined_call_operand.vmem [shape: f32[4,16], index: 0, kind: input, shape index: {}]   ;;  %s56_s1 = inlined_call_operand.vmem [shape: f32[64], index: 1, kind: output, shape index: {}]  }
   0x1   :  { %v4_v0 = vld [vmem:[%s55_s0] sm:$0xf]  ;;  %s36_s0 = smov 48  }
   0x2   :  { %5 = vst [vmem:[#allocation1] sm:$0xf] %v4_v0 }
   0x9   :  { %v10_v1 = vld [vmem:[#allocation1 + $0x3] sm:$0x1]   ;;  %v22_v2 = vld [vmem:[#allocation1 + $0x1] sm:$0x1]   ;;  %v16_v3 = vld [vmem:[#allocation1 + $0x2] sm:$0x1]  }
   0xa   :  { %11 = vrot.lane.b32.xlu0 %v10_v1, %s36_s0  ;;  %23 = vrot.lane.b32.xlu1 %v22_v2, %s37_s8  ;;  %v6_v4 = vld [vmem:[#allocation1] sm:$0x1]  }
   0xb   :  { %8 = vst.msk [vmem:[#allocation0] sm:$0x1] %vm7_vm0, %v6_v4  }
  0x12   :  { %17 = vrot.lane.b32.xlu0 %v16_v3, %s38_s9 }
  0x7c   :  { %v12_v5 = vpop.permute.xlu0 %11   ;;  %v24_v6 = vpop.permute.xlu1 %23  }
  0x7d   :  { %14 = vst.msk [vmem:[#allocation0] sm:$0x1] %vm13_vm1, %v12_v5  }
  0x84   :  { %v18_v7 = vpop.permute.xlu0 %17  }
  0x85   :  { %20 = vst.msk [vmem:[#allocation0] sm:$0x1] %vm19_vm2, %v18_v7  }
  0x86   :  { %26 = vst.msk [vmem:[#allocation0] sm:$0x1] %vm25_vm3, %v24_v6  }
  0x8d   :  { %v29_v8 = vld [vmem:[#allocation0] sm:$0x1] }
  0x8e   :  { %32 = vst [vmem:[%s56_s1] sm:$0x1] %v29_v8 }

// kernel: tile.61
= control target key start
LH: loop header
LB: loop body
LE: loop exit
PB: predicated region body
PF: predicated region fallthrough
CT: control target
= control target key end

     0   :  { %s22_s0 = inlined_call_operand.vmem [shape: f32[8], index: 0, kind: input, shape index: {}]   ;;  %s23_s1 = inlined_call_operand.vmem [shape: f32[4,8], index: 1, kind: output, shape index: {}]  }
   0x1   :  { %v4_v0 = vld [vmem:[%s22_s0] ss:$0 sm:$0xff] }
   0x2   :  { %5 = vst [vmem:[%s23_s1] sm:$0xf] %v4_v0 }

// kernel: tile.62
= control target key start
LH: loop header
LB: loop body
LE: loop exit
PB: predicated region body
PF: predicated region fallthrough
CT: control target
= control target key end

     0   :  { %s37_s8 = smov 8   ;;  %s38_s9 = smov 16   ;;  %vm7_vm0 = vcmask 64512   ;;  %vm13_vm1 = vcmask 261312   ;;  %vm19_vm2 = vcmask 195712   ;;  %vm25_vm3 = vcmask 130112   ;;  %s55_s0 = inlined_call_operand.vmem [shape: f32[4,8], index: 0, kind: input, shape index: {}]   ;;  %s56_s1 = inlined_call_operand.vmem [shape: f32[32], index: 1, kind: output, shape index: {}]  }
   0x1   :  { %v4_v0 = vld [vmem:[%s55_s0] sm:$0xf]  ;;  %s36_s0 = smov 24  }
   0x2   :  { %5 = vst [vmem:[#allocation1] sm:$0xf] %v4_v0 }
   0x9   :  { %v10_v1 = vld [vmem:[#allocation1 + $0x3] sm:$0x1]   ;;  %v22_v2 = vld [vmem:[#allocation1 + $0x1] sm:$0x1]   ;;  %v16_v3 = vld [vmem:[#allocation1 + $0x2] sm:$0x1]  }
   0xa   :  { %11 = vrot.lane.b32.xlu0 %v10_v1, %s36_s0  ;;  %23 = vrot.lane.b32.xlu1 %v22_v2, %s37_s8  ;;  %v6_v4 = vld [vmem:[#allocation1] sm:$0x1]  }
   0xb   :  { %8 = vst.msk [vmem:[#allocation0] sm:$0x1] %vm7_vm0, %v6_v4  }
  0x12   :  { %17 = vrot.lane.b32.xlu0 %v16_v3, %s38_s9 }
  0x7c   :  { %v12_v5 = vpop.permute.xlu0 %11   ;;  %v24_v6 = vpop.permute.xlu1 %23  }
  0x7d   :  { %14 = vst.msk [vmem:[#allocation0] sm:$0x1] %vm13_vm1, %v12_v5  }
  0x84   :  { %v18_v7 = vpop.permute.xlu0 %17  }
  0x85   :  { %20 = vst.msk [vmem:[#allocation0] sm:$0x1] %vm19_vm2, %v18_v7  }
  0x86   :  { %26 = vst.msk [vmem:[#allocation0] sm:$0x1] %vm25_vm3, %v24_v6  }
  0x8d   :  { %v29_v8 = vld [vmem:[#allocation0] sm:$0x1] }
  0x8e   :  { %32 = vst [vmem:[%s56_s1] sm:$0x1] %v29_v8 }

// kernel: powernet_change_forward.1
= control target key start
LH: loop header
LB: loop body
LE: loop exit
PB: predicated region body
PF: predicated region fallthrough
CT: control target
= control target key end

     0   :  { %vm69_vm0 = vcmask 523264   ;;  %v1173_v58 = vmov 0.0   ;;  %vm723_vm1 = vcmask 261120   ;;  %s1805_s2 = inlined_call_operand.vmem [shape: f32[64,256], index: 2, kind: input, shape index: {}]   ;;  %s1806_s0 = inlined_call_operand.vmem [shape: f32[128,64], index: 0, kind: input, shape index: {}]   ;;  %s1807_s6 = inlined_call_operand.vmem [shape: f32[8,128], index: 6, kind: input, shape index: {}]   ;;  %s1808_s3 = inlined_call_operand.vmem [shape: f32[3,128,128], index: 3, kind: input, shape index: {}]   ;;  %s1809_s4 = inlined_call_operand.vmem [shape: f32[3,64,32], index: 4, kind: input, shape index: {}]   ;;  %s1810_s5 = inlined_call_operand.vmem [shape: f32[3,32,32], index: 5, kind: input, shape index: {}]   ;;  %s1811_s7 = inlined_call_operand.vmem [shape: f32[4,32,128], index: 7, kind: input, shape index: {}]   ;;  %s1812_s8 = inlined_call_operand.vmem [shape: f32[2,128], index: 8, kind: input, shape index: {}]   ;;  %s1813_s9 = inlined_call_operand.<no memory space> [shape: f32[1,1], index: 9, kind: input, shape index: {}]   ;;  %s1814_s1 = inlined_call_operand.vmem [shape: f32[8,256], index: 1, kind: input, shape index: {}]   ;;  %s1815_s10 = inlined_call_operand.vmem [shape: f32[8,256], index: 10, kind: output, shape index: {}]  }
   0x1   :  { %v67_v0 = vld [vmem:[%s1805_s2 + $0x70] sm:$0xff]  ;;  %v68_v1 = vld [vmem:[%s1805_s2 + $0x78] sm:$0xff]  ;;  %v65_v2 = vld [vmem:[%s1805_s2 + $0x60] sm:$0xff]  ;;  %548 = vst.msk [vmem:[#allocation3] sm:$0xff] %vm69_vm0, %v1173_v58 }
   0x2   :  { %126 = vmatpush.msra.mxu0 %v67_v0  ;;  %191 = vmatpush.msra.mxu1 %v68_v1  ;;  %v66_v3 = vld [vmem:[%s1805_s2 + $0x68] sm:$0xff]  ;;  %v63_v4 = vld [vmem:[%s1805_s2 + $0x50] sm:$0xff]  ;;  %v64_v5 = vld [vmem:[%s1805_s2 + $0x58] sm:$0xff]  ;;  %549 = vst.msk [vmem:[#allocation3 + $0x28] sm:$0xff] %vm69_vm0, %v1173_v58 }
   0x3   :  { %v61_v6 = vld [vmem:[%s1805_s2 + $0x40] sm:$0xff]  ;;  %v62_v7 = vld [vmem:[%s1805_s2 + $0x48] sm:$0xff]  ;;  %v59_v8 = vld [vmem:[%s1805_s2 + $0x30] sm:$0xff]  ;;  %724 = vst.msk [vmem:[#allocation4] sm:$0xff] %vm723_vm1, %v1173_v58 }
   0x4   :  { %127 = vmatpush.msra.mxu0 %v65_v2  ;;  %192 = vmatpush.msra.mxu1 %v66_v3  ;;  %v60_v9 = vld [vmem:[%s1805_s2 + $0x38] sm:$0xff]  ;;  %v57_v10 = vld [vmem:[%s1805_s2 + $0x20] sm:$0xff]  ;;  %v58_v11 = vld [vmem:[%s1805_s2 + $0x28] sm:$0xff]  ;;  %725 = vst.msk [vmem:[#allocation4 + $0x28] sm:$0xff] %vm723_vm1, %v1173_v58 }
   0x5   :  { %v55_v12 = vld [vmem:[%s1805_s2 + $0x10] sm:$0xff]  ;;  %v56_v13 = vld [vmem:[%s1805_s2 + $0x18] sm:$0xff]  ;;  %v53_v14 = vld [vmem:[%s1805_s2] sm:$0xff] }
   0x6   :  { %128 = vmatpush.msra.mxu0 %v63_v4  ;;  %193 = vmatpush.msra.mxu1 %v64_v5  ;;  %v54_v15 = vld [vmem:[%s1805_s2 + $0x8] sm:$0xff]  ;;  %v37_v16 = vld [vmem:[%s1806_s0] sm:$0xff]  ;;  %v39_v18 = vld [vmem:[%s1806_s0 + $0x10] sm:$0xff] }
   0x7   :  { %v38_v17 = vld [vmem:[%s1806_s0 + $0x8] sm:$0xff]  ;;  %v40_v19 = vld [vmem:[%s1806_s0 + $0x18] sm:$0xff]  ;;  %v41_v20 = vld [vmem:[%s1806_s0 + $0x20] sm:$0xff] }
   0x8   :  { %129 = vmatpush.msra.mxu0 %v61_v6  ;;  %194 = vmatpush.msra.mxu1 %v62_v7  ;;  %v42_v21 = vld [vmem:[%s1806_s0 + $0x28] sm:$0xff]  ;;  %v43_v22 = vld [vmem:[%s1806_s0 + $0x30] sm:$0xff]  ;;  %v44_v23 = vld [vmem:[%s1806_s0 + $0x38] sm:$0xff] }
   0x9   :  { %v45_v24 = vld [vmem:[%s1806_s0 + $0x40] sm:$0xff]  ;;  %v46_v25 = vld [vmem:[%s1806_s0 + $0x48] sm:$0xff]  ;;  %v333_v26 = vld [vmem:[%s1808_s3 + $0x78] sm:$0xff] }
   0xa   :  { %130 = vmatpush.msra.mxu0 %v59_v8  ;;  %195 = vmatpush.msra.mxu1 %v60_v9  ;;  %v332_v27 = vld [vmem:[%s1808_s3 + $0x70] sm:$0xff]  ;;  %v331_v28 = vld [vmem:[%s1808_s3 + $0x68] sm:$0xff]  ;;  %v330_v29 = vld [vmem:[%s1808_s3 + $0x60] sm:$0xff] }
   0xb   :  { %393 = vmatpush.msra.mxu3 %v333_v26  ;;  %v47_v30 = vld [vmem:[%s1806_s0 + $0x50] sm:$0xff]  ;;  %v1076_v31 = vld [vmem:[%s1808_s3 + $0xf8] sm:$0xff]  ;;  %v1074_v35 = vld [vmem:[%s1808_s3 + $0xe8] sm:$0xff] }
   0xc   :  { %131 = vmatpush.msra.mxu0 %v57_v10  ;;  %196 = vmatpush.msra.mxu1 %v58_v11  ;;  %v329_v32 = vld [vmem:[%s1808_s3 + $0x58] sm:$0xff]  ;;  %v1075_v33 = vld [vmem:[%s1808_s3 + $0xf0] sm:$0xff]  ;;  %v327_v36 = vld [vmem:[%s1808_s3 + $0x48] sm:$0xff] }
   0xd   :  { %394 = vmatpush.msra.mxu3 %v332_v27  ;;  %352 = vmatpush.msra.mxu2 %v1076_v31  ;;  %v328_v34 = vld [vmem:[%s1808_s3 + $0x50] sm:$0xff]  ;;  %v1073_v37 = vld [vmem:[%s1808_s3 + $0xe0] sm:$0xff]  ;;  %v48_v39 = vld [vmem:[%s1806_s0 + $0x58] sm:$0xff] }
   0xe   :  { %132 = vmatpush.msra.mxu0 %v55_v12  ;;  %197 = vmatpush.msra.mxu1 %v56_v13  ;;  %v326_v38 = vld [vmem:[%s1808_s3 + $0x40] sm:$0xff]  ;;  %v1072_v40 = vld [vmem:[%s1808_s3 + $0xd8] sm:$0xff]  ;;  %v1071_v42 = vld [vmem:[%s1808_s3 + $0xd0] sm:$0xff] }
   0xf   :  { %395 = vmatpush.msra.mxu3 %v331_v28  ;;  %353 = vmatpush.msra.mxu2 %v1075_v33  ;;  %v325_v41 = vld [vmem:[%s1808_s3 + $0x38] sm:$0xff]  ;;  %v324_v43 = vld [vmem:[%s1808_s3 + $0x30] sm:$0xff]  ;;  %v1070_v44 = vld [vmem:[%s1808_s3 + $0xc8] sm:$0xff] }
  0x10   :  { %133 = vmatpush.msra.mxu0 %v53_v14  ;;  %198 = vmatpush.msra.mxu1 %v54_v15  ;;  %v323_v45 = vld [vmem:[%s1808_s3 + $0x28] sm:$0xff]  ;;  %v49_v46 = vld [vmem:[%s1806_s0 + $0x60] sm:$0xff]  ;;  %v1068_v49 = vld [vmem:[%s1808_s3 + $0xb8] sm:$0xff] }
  0x11   :  { %1029 = vmatmul.msk.f32.vlgmr.msra.gmra.mxu0 %vm69_vm0, %v37_v16  ;;  %1045 = vmatmul.msk.f32.vlgmr.msra.gmra.mxu1 %vm69_vm0, %v37_v16  ;;  %v1069_v47 = vld [vmem:[%s1808_s3 + $0xc0] sm:$0xff]  ;;  %v321_v50 = vld [vmem:[%s1808_s3 + $0x18] sm:$0xff]  ;;  %v1067_v51 = vld [vmem:[%s1808_s3 + $0xb0] sm:$0xff] }
  0x12   :  { %396 = vmatpush.msra.mxu3 %v330_v29  ;;  %354 = vmatpush.msra.mxu2 %v1074_v35  ;;  %v322_v48 = vld [vmem:[%s1808_s3 + $0x20] sm:$0xff]  ;;  %v320_v52 = vld [vmem:[%s1808_s3 + $0x10] sm:$0xff]  ;;  %v1066_v53 = vld [vmem:[%s1808_s3 + $0xa8] sm:$0xff] }
  0x13   :  { %v319_v54 = vld [vmem:[%s1808_s3 + $0x8] sm:$0xff]  ;;  %v1065_v56 = vld [vmem:[%s1808_s3 + $0xa0] sm:$0xff]  ;;  %v1064_v59 = vld [vmem:[%s1808_s3 + $0x98] sm:$0xff] }
  0x14   :  { %397 = vmatpush.msra.mxu3 %v329_v32  ;;  %355 = vmatpush.msra.mxu2 %v1073_v37  ;;  %v50_v55 = vld [vmem:[%s1806_s0 + $0x68] sm:$0xff]  ;;  %v318_v57 = vld [vmem:[%s1808_s3] sm:$0xff]  ;;  %v1063_v60 = vld [vmem:[%s1808_s3 + $0x90] sm:$0xff] }
  0x15   :  { %v1062_v61 = vld [vmem:[%s1808_s3 + $0x88] sm:$0xff]  ;;  %v51_v62 = vld [vmem:[%s1806_s0 + $0x70] sm:$0xff]  ;;  %v1061_v63 = vld [vmem:[%s1808_s3 + $0x80] sm:$0xff] }
  0x16   :  { %398 = vmatpush.msra.mxu3 %v328_v34  ;;  %356 = vmatpush.msra.mxu2 %v1072_v40  ;;  %v52_v0 = vld [vmem:[%s1806_s0 + $0x78] sm:$0xff]  ;;  %v1467_v7 = vld [vmem:[%s1807_s6] ss:$0 sm:$0xff]  ;;  %v1472_v9 = vld [vmem:[%s1807_s6 + $0x1] ss:$0 sm:$0xff] }
  0x17   :  { %v1092_v31 = vld [vmem:[%s1808_s3 + $0x178] sm:$0xff]  ;;  %v1091_v32 = vld [vmem:[%s1808_s3 + $0x170] sm:$0xff]  ;;  %v1090_v37 = vld [vmem:[%s1808_s3 + $0x168] sm:$0xff] }
  0x18   :  { %399 = vmatpush.msra.mxu3 %v327_v36  ;;  %357 = vmatpush.msra.mxu2 %v1071_v42 }
  0x19   :  { %1030 = vmatmul.msk.f32.gmra.mxu0 %vm69_vm0, %v38_v17  ;;  %1046 = vmatmul.msk.f32.gmra.mxu1 %vm69_vm0, %v38_v17 }
  0x1a   :  { %400 = vmatpush.msra.mxu3 %v326_v38  ;;  %358 = vmatpush.msra.mxu2 %v1070_v44  ;;  %v1089_v38 = vld [vmem:[%s1808_s3 + $0x160] sm:$0xff] }
  0x1c   :  { %401 = vmatpush.msra.mxu3 %v325_v41  ;;  %359 = vmatpush.msra.mxu2 %v1069_v47 }
  0x1e   :  { %402 = vmatpush.msra.mxu3 %v324_v43  ;;  %360 = vmatpush.msra.mxu2 %v1068_v49 }
  0x20   :  { %403 = vmatpush.msra.mxu3 %v323_v45  ;;  %361 = vmatpush.msra.mxu2 %v1067_v51  ;;  %v1088_v45 = vld [vmem:[%s1808_s3 + $0x158] sm:$0xff]  ;;  %v1086_v51 = vld [vmem:[%s1808_s3 + $0x148] sm:$0xff] }
  0x21   :  { %1031 = vmatmul.msk.f32.gmra.mxu0 %vm69_vm0, %v39_v18  ;;  %1047 = vmatmul.msk.f32.gmra.mxu1 %vm69_vm0, %v39_v18 }
  0x22   :  { %404 = vmatpush.msra.mxu3 %v322_v48  ;;  %362 = vmatpush.msra.mxu2 %v1066_v53 }
  0x24   :  { %405 = vmatpush.msra.mxu3 %v321_v50  ;;  %363 = vmatpush.msra.mxu2 %v1065_v56 }
  0x26   :  { %406 = vmatpush.msra.mxu3 %v320_v52  ;;  %364 = vmatpush.msra.mxu2 %v1064_v59  ;;  %v1085_v52 = vld [vmem:[%s1808_s3 + $0x140] sm:$0xff] }
  0x28   :  { %407 = vmatpush.msra.mxu3 %v319_v54  ;;  %365 = vmatpush.msra.mxu2 %v1063_v60  ;;  %v1084_v60 = vld [vmem:[%s1808_s3 + $0x138] sm:$0xff] }
  0x29   :  { %1032 = vmatmul.msk.f32.gmra.mxu0 %vm69_vm0, %v40_v19  ;;  %1048 = vmatmul.msk.f32.gmra.mxu1 %vm69_vm0, %v40_v19 }
  0x2a   :  { %408 = vmatpush.msra.mxu3 %v318_v57  ;;  %366 = vmatpush.msra.mxu2 %v1062_v61  ;;  %v1083_v61 = vld [vmem:[%s1808_s3 + $0x130] sm:$0xff] }
  0x2b   :  { %409 = vmatmul.f32.vlgmr.msra.gmra.mxu3 %v1173_v58 }
  0x2c   :  { %367 = vmatpush.msra.mxu2 %v1061_v63 }
  0x2e   :  { %459 = vmatpush.msrb.mxu2 %v1092_v31 }
  0x30   :  { %460 = vmatpush.msrb.mxu2 %v1091_v32 }
  0x31   :  { %1033 = vmatmul.msk.f32.gmra.mxu0 %vm69_vm0, %v41_v20  ;;  %1049 = vmatmul.msk.f32.gmra.mxu1 %vm69_vm0, %v41_v20 }
  0x32   :  { %461 = vmatpush.msrb.mxu2 %v1090_v37 }
  0x34   :  { %462 = vmatpush.msrb.mxu2 %v1089_v38 }
  0x36   :  { %463 = vmatpush.msrb.mxu2 %v1088_v45 }
  0x39   :  { %1034 = vmatmul.msk.f32.gmra.mxu0 %vm69_vm0, %v42_v21  ;;  %1050 = vmatmul.msk.f32.gmra.mxu1 %vm69_vm0, %v42_v21 }
  0x41   :  { %1035 = vmatmul.msk.f32.gmra.mxu0 %vm69_vm0, %v43_v22  ;;  %1051 = vmatmul.msk.f32.gmra.mxu1 %vm69_vm0, %v43_v22 }
  0x49   :  { %1036 = vmatmul.msk.f32.gmra.mxu0 %vm69_vm0, %v44_v23  ;;  %1052 = vmatmul.msk.f32.gmra.mxu1 %vm69_vm0, %v44_v23 }
  0x51   :  { %1037 = vmatmul.msk.f32.gmra.mxu0 %vm69_vm0, %v45_v24  ;;  %1053 = vmatmul.msk.f32.gmra.mxu1 %vm69_vm0, %v45_v24 }
  0x59   :  { %1038 = vmatmul.msk.f32.gmra.mxu0 %vm69_vm0, %v46_v25  ;;  %1054 = vmatmul.msk.f32.gmra.mxu1 %vm69_vm0, %v46_v25 }
  0x61   :  { %1039 = vmatmul.msk.f32.gmra.mxu0 %vm69_vm0, %v47_v30  ;;  %1055 = vmatmul.msk.f32.gmra.mxu1 %vm69_vm0, %v47_v30 }
  0x69   :  { %1040 = vmatmul.msk.f32.gmra.mxu0 %vm69_vm0, %v48_v39  ;;  %1056 = vmatmul.msk.f32.gmra.mxu1 %vm69_vm0, %v48_v39 }
  0x71   :  { %1041 = vmatmul.msk.f32.gmra.mxu0 %vm69_vm0, %v49_v46  ;;  %1057 = vmatmul.msk.f32.gmra.mxu1 %vm69_vm0, %v49_v46  ;;  %v1087_v46 = vld [vmem:[%s1808_s3 + $0x150] sm:$0xff] }
  0x72   :  { %464 = vmatpush.msrb.mxu2 %v1087_v46 }
  0x74   :  { %465 = vmatpush.msrb.mxu2 %v1086_v51 }
  0x76   :  { %466 = vmatpush.msrb.mxu2 %v1085_v52 }
  0x78   :  { %467 = vmatpush.msrb.mxu2 %v1084_v60 }
  0x79   :  { %1042 = vmatmul.msk.f32.gmra.mxu0 %vm69_vm0, %v50_v55  ;;  %1058 = vmatmul.msk.f32.gmra.mxu1 %vm69_vm0, %v50_v55 }
  0x7a   :  { %468 = vmatpush.msrb.mxu2 %v1083_v61 }
  0x81   :  { %1043 = vmatmul.msk.f32.gmra.mxu0 %vm69_vm0, %v51_v62  ;;  %1059 = vmatmul.msk.f32.gmra.mxu1 %vm69_vm0, %v51_v62 }
  0x89   :  { %1044 = vmatmul.msk.f32.gmra.mxu0 %vm69_vm0, %v52_v0  ;;  %1060 = vmatmul.msk.f32.gmra.mxu1 %vm69_vm0, %v52_v0 }
  0x8e   :  { %v135_v1 = vpop.f32.mrf.mxu0  ;;  %v200_v2 = vpop.f32.mrf.mxu1 }
  0x8f   :  { %v248_v5 = vmax.f32 %v135_v1, %v200_v2  ;;  %v1082_v2 = vld [vmem:[%s1808_s3 + $0x128] sm:$0xff] }
  0x90   :  { %469 = vmatpush.msrb.mxu2 %v1082_v2  ;;  %v1099_v2 = vld [vmem:[%s1809_s4 + $0x70] sm:$0xff] }
  0x96   :  { %v138_v3 = vpop.f32.mrf.mxu0  ;;  %v203_v4 = vpop.f32.mrf.mxu1 }
  0x97   :  { %v249_v6 = vmax.f32 %v138_v3, %v203_v4  ;;  %v1081_v3 = vld [vmem:[%s1808_s3 + $0x120] sm:$0xff] }
  0x98   :  { %470 = vmatpush.msrb.mxu2 %v1081_v3  ;;  %v1114_v3 = vld [vmem:[%s1809_s4 + $0xa8] sm:$0xff] }
  0x99   :  { %v264_v8 = vmax.f32 %v248_v5, %v249_v6 }
  0x9b   :  { %v274_v10 = vmul.f32 %v1467_v7, %v264_v8 }
  0x9d   :  { %v284_v11 = vadd.f32 %v1472_v9, %v274_v10 }
  0x9e   :  { %v141_v12 = vpop.f32.mrf.mxu0  ;;  %v206_v13 = vpop.f32.mrf.mxu1 }
  0x9f   :  { %v292_v14 = vmax.f32 %v284_v11, 0.0  ;;  %v250_v17 = vmax.f32 %v141_v12, %v206_v13  ;;  %v1080_v11 = vld [vmem:[%s1808_s3 + $0x118] sm:$0xff]  ;;  %v1079_v12 = vld [vmem:[%s1808_s3 + $0x110] sm:$0xff] }
  0xa0   :  { %471 = vmatpush.msrb.mxu2 %v1080_v11 }
  0xa1   :  { %368 = vmatmul.f32.vlgmr.msra.gmra.mxu2 %v292_v14  ;;  %412 = vmatmul.f32.gmra.mxu3 %v292_v14 }
  0xa2   :  { %472 = vmatpush.msrb.mxu2 %v1079_v12 }
  0xa6   :  { %v144_v15 = vpop.f32.mrf.mxu0  ;;  %v209_v16 = vpop.f32.mrf.mxu1 }
  0xa7   :  { %v251_v18 = vmax.f32 %v144_v15, %v209_v16 }
  0xa9   :  { %v265_v19 = vmax.f32 %v250_v17, %v251_v18  ;;  %v1078_v18 = vld [vmem:[%s1808_s3 + $0x108] sm:$0xff] }
  0xaa   :  { %473 = vmatpush.msrb.mxu2 %v1078_v18 }
  0xab   :  { %v275_v20 = vmul.f32 %v1467_v7, %v265_v19  ;;  %v1077_v19 = vld [vmem:[%s1808_s3 + $0x100] sm:$0xff]  ;;  %s1174_s3 = smov 64  }
  0xac   :  { %474 = vmatpush.msrb.mxu2 %v1077_v19 }
  0xad   :  { %v285_v21 = vadd.f32 %v1472_v9, %v275_v20 }
  0xae   :  { %v147_v22 = vpop.f32.mrf.mxu0  ;;  %v212_v23 = vpop.f32.mrf.mxu1 }
  0xaf   :  { %v1478_v24 = vmax.f32 %v285_v21, 0.0  ;;  %v252_v27 = vmax.f32 %v147_v22, %v212_v23  ;;  %v410_v46 = vpop.f32.mrf.mxu3 }
  0xb1   :  { %371 = vmatmul.f32.gmra.mxu2 %v1478_v24  ;;  %415 = vmatmul.f32.gmra.mxu3 %v1478_v24 }
  0xb6   :  { %v150_v25 = vpop.f32.mrf.mxu0  ;;  %v215_v26 = vpop.f32.mrf.mxu1 }
  0xb7   :  { %v253_v28 = vmax.f32 %v150_v25, %v215_v26 }
  0xb9   :  { %v266_v29 = vmax.f32 %v252_v27, %v253_v28 }
  0xbb   :  { %v276_v30 = vmul.f32 %v1467_v7, %v266_v29 }
  0xbd   :  { %v286_v33 = vadd.f32 %v1472_v9, %v276_v30 }
  0xbe   :  { %v153_v34 = vpop.f32.mrf.mxu0  ;;  %v218_v35 = vpop.f32.mrf.mxu1 }
  0xbf   :  { %v1490_v36 = vmax.f32 %v286_v33, 0.0  ;;  %v254_v41 = vmax.f32 %v153_v34, %v218_v35 }
  0xc1   :  { %374 = vmatmul.f32.gmra.mxu2 %v1490_v36  ;;  %418 = vmatmul.f32.gmra.mxu3 %v1490_v36 }
  0xc6   :  { %v156_v39 = vpop.f32.mrf.mxu0  ;;  %v221_v40 = vpop.f32.mrf.mxu1 }
  0xc7   :  { %v255_v42 = vmax.f32 %v156_v39, %v221_v40 }
  0xc9   :  { %v267_v43 = vmax.f32 %v254_v41, %v255_v42 }
  0xcb   :  { %v277_v44 = vmul.f32 %v1467_v7, %v267_v43 }
  0xcd   :  { %v287_v47 = vadd.f32 %v1472_v9, %v277_v44 }
  0xce   :  { %v159_v48 = vpop.f32.mrf.mxu0  ;;  %v224_v49 = vpop.f32.mrf.mxu1 }
  0xcf   :  { %v1508_v50 = vmax.f32 %v287_v47, 0.0  ;;  %v256_v55 = vmax.f32 %v159_v48, %v224_v49 }
  0xd1   :  { %377 = vmatmul.f32.gmra.mxu2 %v1508_v50  ;;  %421 = vmatmul.f32.gmra.mxu3 %v1508_v50 }
  0xd6   :  { %v162_v53 = vpop.f32.mrf.mxu0  ;;  %v227_v54 = vpop.f32.mrf.mxu1 }
  0xd7   :  { %v257_v56 = vmax.f32 %v162_v53, %v227_v54 }
  0xd9   :  { %v268_v57 = vmax.f32 %v256_v55, %v257_v56 }
  0xdb   :  { %v278_v59 = vmul.f32 %v1467_v7, %v268_v57 }
  0xdd   :  { %v288_v62 = vadd.f32 %v1472_v9, %v278_v59 }
  0xde   :  { %v165_v63 = vpop.f32.mrf.mxu0  ;;  %v230_v0 = vpop.f32.mrf.mxu1 }
  0xdf   :  { %v296_v1 = vmax.f32 %v288_v62, 0.0  ;;  %v258_v6 = vmax.f32 %v165_v63, %v230_v0  ;;  %v1116_v62 = vld [vmem:[%s1809_s4 + $0xb8] sm:$0xff]  ;;  %v1115_v63 = vld [vmem:[%s1809_s4 + $0xb0] sm:$0xff] }
  0xe0   :  { %v1100_v0 = vld [vmem:[%s1809_s4 + $0x78] sm:$0xff]  ;;  %682 = vmatpush.msrb.mxu0 %v1116_v62 }
  0xe1   :  { %380 = vmatmul.f32.gmra.mxu2 %v296_v1  ;;  %424 = vmatmul.f32.gmra.mxu3 %v296_v1 }
  0xe2   :  { %596 = vmatpush.msrb.mxu3 %v1100_v0  ;;  %683 = vmatpush.msrb.mxu0 %v1115_v63 }
  0xe4   :  { %597 = vmatpush.msrb.mxu3 %v1099_v2  ;;  %684 = vmatpush.msrb.mxu0 %v1114_v3  ;;  %v1124_v2 = vld [vmem:[%s1810_s5 + $0x38] sm:$0xff]  ;;  %v1123_v3 = vld [vmem:[%s1810_s5 + $0x30] sm:$0xff] }
  0xe5   :  { %768 = vmatpush.msrb.mxu1 %v1124_v2  ;;  %v1148_v2 = vld [vmem:[%s1811_s7 + $0x48] sm:$0xff] }
  0xe6   :  { %v168_v4 = vpop.f32.mrf.mxu0  ;;  %v233_v5 = vpop.f32.mrf.mxu1 }
  0xe7   :  { %v259_v8 = vmax.f32 %v168_v4, %v233_v5  ;;  %v1098_v4 = vld [vmem:[%s1809_s4 + $0x68] sm:$0xff]  ;;  %769 = vmatpush.msrb.mxu1 %v1123_v3 }
  0xe8   :  { %598 = vmatpush.msrb.mxu3 %v1098_v4  ;;  %v554_v4 = vld [vmem:[#allocation3] sm:$0xff] }
  0xe9   :  { %v269_v10 = vmax.f32 %v258_v6, %v259_v8 }
  0xeb   :  { %v279_v13 = vmul.f32 %v1467_v7, %v269_v10 }
  0xed   :  { %v289_v14 = vadd.f32 %v1472_v9, %v279_v13 }
  0xee   :  { %v171_v15 = vpop.f32.mrf.mxu0  ;;  %v236_v16 = vpop.f32.mrf.mxu1 }
  0xef   :  { %v297_v17 = vmax.f32 %v289_v14, 0.0  ;;  %v260_v22 = vmax.f32 %v171_v15, %v236_v16 }
  0xf1   :  { %383 = vmatmul.f32.gmra.mxu2 %v297_v17  ;;  %427 = vmatmul.f32.gmra.mxu3 %v297_v17 }
  0xf6   :  { %v174_v20 = vpop.f32.mrf.mxu0  ;;  %v239_v21 = vpop.f32.mrf.mxu1 }
  0xf7   :  { %v261_v23 = vmax.f32 %v174_v20, %v239_v21 }
  0xf9   :  { %v270_v25 = vmax.f32 %v260_v22, %v261_v23 }
  0xfb   :  { %v280_v26 = vmul.f32 %v1467_v7, %v270_v25  ;;  %v1097_v25 = vld [vmem:[%s1809_s4 + $0x60] sm:$0xff] }
  0xfc   :  { %599 = vmatpush.msrb.mxu3 %v1097_v25 }
  0xfd   :  { %v290_v27 = vadd.f32 %v1472_v9, %v280_v26  ;;  %v1113_v26 = vld [vmem:[%s1809_s4 + $0xa0] sm:$0xff] }
  0xfe   :  { %v177_v28 = vpop.f32.mrf.mxu0  ;;  %v242_v29 = vpop.f32.mrf.mxu1  ;;  %685 = vmatpush.msrb.mxu0 %v1113_v26 }
  0xff   :  { %v298_v30 = vmax.f32 %v290_v27, 0.0  ;;  %v262_v33 = vmax.f32 %v177_v28, %v242_v29  ;;  %v1096_v27 = vld [vmem:[%s1809_s4 + $0x58] sm:$0xff]  ;;  %v1095_v28 = vld [vmem:[%s1809_s4 + $0x50] sm:$0xff]  ;;  %v1094_v29 = vld [vmem:[%s1809_s4 + $0x48] sm:$0xff] }
 0x100   :  { %600 = vmatpush.msrb.mxu3 %v1096_v27  ;;  %v1166_v27 = vld [vmem:[%s1807_s6 + $0x4] ss:$0 sm:$0xff] }
 0x101   :  { %386 = vmatmul.f32.gmra.mxu2 %v298_v30  ;;  %430 = vmatmul.f32.gmra.mxu3 %v298_v30 }
 0x102   :  { %601 = vmatpush.msrb.mxu3 %v1095_v28 }
 0x104   :  { %602 = vmatpush.msrb.mxu3 %v1094_v29  ;;  %v1167_v29 = vld [vmem:[%s1807_s6 + $0x5] ss:$0 sm:$0xff] }
 0x106   :  { %v180_v31 = vpop.f32.mrf.mxu0  ;;  %v245_v32 = vpop.f32.mrf.mxu1 }
 0x107   :  { %v263_v34 = vmax.f32 %v180_v31, %v245_v32  ;;  %v1112_v31 = vld [vmem:[%s1809_s4 + $0x98] sm:$0xff]  ;;  %v1111_v32 = vld [vmem:[%s1809_s4 + $0x90] sm:$0xff] }
 0x108   :  { %686 = vmatpush.msrb.mxu0 %v1112_v31 }
 0x109   :  { %v271_v35 = vmax.f32 %v262_v33, %v263_v34  ;;  %v1110_v33 = vld [vmem:[%s1809_s4 + $0x88] sm:$0xff]  ;;  %v1109_v34 = vld [vmem:[%s1809_s4 + $0x80] sm:$0xff] }
 0x10a   :  { %687 = vmatpush.msrb.mxu0 %v1111_v32 }
 0x10b   :  { %v281_v37 = vmul.f32 %v1467_v7, %v271_v35  ;;  %v1164_v35 = vld [vmem:[%s1807_s6 + $0x2] ss:$0 sm:$0xff] }
 0x10c   :  { %688 = vmatpush.msrb.mxu0 %v1110_v33 }
 0x10d   :  { %v291_v38 = vadd.f32 %v1472_v9, %v281_v37 }
 0x10e   :  { %689 = vmatpush.msrb.mxu0 %v1109_v34 }
 0x10f   :  { %v299_v39 = vmax.f32 %v291_v38, 0.0  ;;  %v1165_v38 = vld [vmem:[%s1807_s6 + $0x3] ss:$0 sm:$0xff] }
 0x111   :  { %389 = vmatmul.f32.gmra.mxu2 %v299_v39 }
 0x119   :  { %475 = vmatmul.f32.vlgmr.msrb.gmra.mxu2 %v1478_v24 }
 0x121   :  { %478 = vmatmul.f32.gmra.mxu2 %v1490_v36 }
 0x124   :  { %v369_v40 = vpop.f32.mrf.mxu2  ;;  %v413_v47 = vpop.f32.mrf.mxu3 }
 0x125   :  { %v411_v36 = vadd.f32 %v410_v46, %v369_v40 }
 0x129   :  { %481 = vmatmul.f32.gmra.mxu2 %v1508_v50 }
 0x131   :  { %484 = vmatmul.f32.gmra.mxu2 %v296_v1 }
 0x134   :  { %v372_v41 = vpop.f32.mrf.mxu2 }
 0x135   :  { %v414_v48 = vadd.f32 %v413_v47, %v372_v41 }
 0x139   :  { %487 = vmatmul.f32.gmra.mxu2 %v297_v17 }
 0x141   :  { %490 = vmatmul.f32.gmra.mxu2 %v298_v30  ;;  %v1093_v30 = vld [vmem:[%s1809_s4 + $0x40] sm:$0xff] }
 0x142   :  { %603 = vmatpush.msrb.mxu3 %v1093_v30 }
 0x144   :  { %v375_v42 = vpop.f32.mrf.mxu2 }
 0x149   :  { %493 = vmatmul.f32.gmra.mxu2 %v299_v39 }
 0x151   :  { %496 = vmatmul.f32.gmra.mxu2 %v1173_v58  ;;  %v416_v58 = vpop.f32.mrf.mxu3 }
 0x152   :  { %v417_v55 = vadd.f32 %v416_v58, %v375_v42 }
 0x154   :  { %v378_v7 = vpop.f32.mrf.mxu2 }
 0x159   :  { %v419_v54 = vpop.f32.mrf.mxu3 }
 0x15a   :  { %v420_v56 = vadd.f32 %v419_v54, %v378_v7  ;;  %v565_v7 = vld [vmem:[%s1809_s4 + $0x38] sm:$0xff]  ;;  %v558_v54 = vld [vmem:[%s1809_s4] sm:$0xff] }
 0x15b   :  { %628 = vmatpush.msra.mxu3 %v565_v7 }
 0x161   :  { %v422_v1 = vpop.f32.mrf.mxu3 }
 0x164   :  { %v381_v43 = vpop.f32.mrf.mxu2 }
 0x165   :  { %v423_v8 = vadd.f32 %v422_v1, %v381_v43  ;;  %v564_v43 = vld [vmem:[%s1809_s4 + $0x30] sm:$0xff] }
 0x166   :  { %629 = vmatpush.msra.mxu3 %v564_v43 }
 0x169   :  { %v425_v6 = vpop.f32.mrf.mxu3 }
 0x174   :  { %v384_v9 = vpop.f32.mrf.mxu2  ;;  %v428_v15 = vpop.f32.mrf.mxu3 }
 0x175   :  { %v426_v10 = vadd.f32 %v425_v6, %v384_v9  ;;  %v737_v6 = vld [vmem:[%s1810_s5 + $0x18] sm:$0xff] }
 0x176   :  { %800 = vmatpush.msra.mxu2 %v737_v6  ;;  %v1155_v6 = vld [vmem:[%s1811_s7 + $0x78] sm:$0xff] }
 0x184   :  { %v387_v44 = vpop.f32.mrf.mxu2  ;;  %v431_v17 = vpop.f32.mrf.mxu3 }
 0x185   :  { %v429_v18 = vadd.f32 %v428_v15, %v387_v44 }
 0x194   :  { %v390_v45 = vpop.f32.mrf.mxu2 }
 0x195   :  { %v432_v19 = vadd.f32 %v431_v17, %v390_v45  ;;  %v730_v17 = vld [vmem:[#allocation4] sm:$0xff] }
 0x19c   :  { %v476_v24 = vpop.f32.mrf.mxu2 }
 0x19d   :  { %v500_v50 = vadd.f32 %v476_v24, %v411_v36  ;;  %v563_v36 = vld [vmem:[%s1809_s4 + $0x28] sm:$0xff] }
 0x19e   :  { %630 = vmatpush.msra.mxu3 %v563_v36 }
 0x1a4   :  { %v479_v49 = vpop.f32.mrf.mxu2 }
 0x1a5   :  { %v501_v51 = vadd.f32 %v479_v49, %v414_v48  ;;  %v562_v48 = vld [vmem:[%s1809_s4 + $0x20] sm:$0xff]  ;;  %v561_v49 = vld [vmem:[%s1809_s4 + $0x18] sm:$0xff] }
 0x1a6   :  { %631 = vmatpush.msra.mxu3 %v562_v48 }
 0x1a7   :  { %v1554_v52 = vmax.f32 %v500_v50, %v501_v51  ;;  %v560_v50 = vld [vmem:[%s1809_s4 + $0x10] sm:$0xff] }
 0x1a8   :  { %632 = vmatpush.msra.mxu3 %v561_v49 }
 0x1a9   :  { %516 = vrot.lane.b32.xlu0 %v1554_v52, %s1174_s3 }
 0x1aa   :  { %633 = vmatpush.msra.mxu3 %v560_v50 }
 0x1ac   :  { %v482_v53 = vpop.f32.mrf.mxu2 }
 0x1ad   :  { %v502_v59 = vadd.f32 %v482_v53, %v417_v55  ;;  %v559_v53 = vld [vmem:[%s1809_s4 + $0x8] sm:$0xff] }
 0x1ae   :  { %634 = vmatpush.msra.mxu3 %v559_v53 }
 0x1b0   :  { %635 = vmatpush.msra.mxu3 %v558_v54  ;;  %v820_v54 = vld [vmem:[#allocation4 + $0x28] sm:$0xff] }
 0x1b4   :  { %v485_v57 = vpop.f32.mrf.mxu2 }
 0x1b5   :  { %v503_v60 = vadd.f32 %v485_v57, %v420_v56 }
 0x1b7   :  { %v1558_v61 = vmax.f32 %v502_v59, %v503_v60 }
 0x1b9   :  { %518 = vrot.lane.b32.xlu0 %v1558_v61, %s1174_s3 }
 0x1bc   :  { %v488_v5 = vpop.f32.mrf.mxu2 }
 0x1bd   :  { %v504_v12 = vadd.f32 %v488_v5, %v423_v8  ;;  %v652_v5 = vld [vmem:[#allocation3 + $0x28] sm:$0xff] }
 0x1be   :  { %v1122_v8 = vld [vmem:[%s1810_s5 + $0x28] sm:$0xff] }
 0x1bf   :  { %770 = vmatpush.msrb.mxu1 %v1122_v8  ;;  %v1154_v8 = vld [vmem:[%s1811_s7 + $0x70] sm:$0xff] }
 0x1c4   :  { %v491_v11 = vpop.f32.mrf.mxu2 }
 0x1c5   :  { %v505_v13 = vadd.f32 %v491_v11, %v426_v10  ;;  %v736_v10 = vld [vmem:[%s1810_s5 + $0x10] sm:$0xff]  ;;  %v735_v11 = vld [vmem:[%s1810_s5 + $0x8] sm:$0xff] }
 0x1c6   :  { %801 = vmatpush.msra.mxu2 %v736_v10  ;;  %v1153_v10 = vld [vmem:[%s1811_s7 + $0x68] sm:$0xff] }
 0x1c7   :  { %v1580_v14 = vmax.f32 %v504_v12, %v505_v13  ;;  %v1136_v12 = vld [vmem:[%s1810_s5 + $0x58] sm:$0xff]  ;;  %v1121_v13 = vld [vmem:[%s1810_s5 + $0x20] sm:$0xff] }
 0x1c8   :  { %802 = vmatpush.msra.mxu2 %v735_v11  ;;  %771 = vmatpush.msrb.mxu1 %v1121_v13  ;;  %v1152_v13 = vld [vmem:[%s1811_s7 + $0x60] sm:$0xff] }
 0x1c9   :  { %520 = vrot.lane.b32.xlu1 %v1580_v14, %s1174_s3 }
 0x1cc   :  { %v494_v16 = vpop.f32.mrf.mxu2 }
 0x1cd   :  { %v506_v21 = vadd.f32 %v494_v16, %v429_v18  ;;  %v734_v16 = vld [vmem:[%s1810_s5] sm:$0xff]  ;;  %v1135_v18 = vld [vmem:[%s1810_s5 + $0x50] sm:$0xff] }
 0x1ce   :  { %803 = vmatpush.msra.mxu2 %v734_v16 }
 0x1cf   :  { %1129 = vmatmul.msk.f32.vlgmr.msra.gmra.mxu2 %vm723_vm1, %v730_v17  ;;  %v1169_v17 = vld [vmem:[%s1807_s6 + $0x7] ss:$0 sm:$0xff] }
 0x1d4   :  { %v497_v20 = vpop.f32.mrf.mxu2 }
 0x1d5   :  { %v507_v22 = vadd.f32 %v497_v20, %v432_v19  ;;  %v1134_v20 = vld [vmem:[%s1810_s5 + $0x48] sm:$0xff] }
 0x1d7   :  { %v1584_v23 = vmax.f32 %v506_v21, %v507_v22  ;;  %v1133_v22 = vld [vmem:[%s1810_s5 + $0x40] sm:$0xff] }
 0x1d9   :  { %522 = vrot.lane.b32.xlu1 %v1584_v23, %s1174_s3 }
 0x21b   :  { %v517_v37 = vpop.permute.xlu0 %516 }
 0x21c   :  { %v528_v39 = vmax.f32 %v1554_v52, %v517_v37 }
 0x21e   :  { %v534_v40 = vmul.f32 %v1164_v35, %v528_v39 }
 0x220   :  { %v540_v41 = vadd.f32 %v1165_v38, %v534_v40 }
 0x222   :  { %v544_v42 = vmax.f32 %v540_v41, 0.0 }
 0x224   :  { %550 = vst.msk [vmem:[#allocation3 + $0x8] sm:$0xff] %vm69_vm0, %v544_v42 }
 0x22b   :  { %v519_v9 = vpop.permute.xlu0 %518  ;;  %v555_v44 = vld [vmem:[#allocation3 + $0x8] sm:$0xff] }
 0x22c   :  { %v529_v45 = vmax.f32 %v1558_v61, %v519_v9  ;;  %1101 = vmatmul.msk.f32.vlgmr.msrb.gmra.mxu3 %vm69_vm0, %v555_v44 }
 0x22d   :  { %850 = vmatpush.msrb.mxu3 %v1136_v12  ;;  %v1168_v12 = vld [vmem:[%s1807_s6 + $0x6] ss:$0 sm:$0xff] }
 0x22e   :  { %v535_v46 = vmul.f32 %v1164_v35, %v529_v45 }
 0x22f   :  { %851 = vmatpush.msrb.mxu3 %v1135_v18 }
 0x230   :  { %v541_v24 = vadd.f32 %v1165_v38, %v535_v46 }
 0x231   :  { %852 = vmatpush.msrb.mxu3 %v1134_v20 }
 0x232   :  { %v545_v47 = vmax.f32 %v541_v24, 0.0 }
 0x233   :  { %853 = vmatpush.msrb.mxu3 %v1133_v22 }
 0x234   :  { %551 = vst.msk [vmem:[#allocation3 + $0x10] sm:$0xff] %vm69_vm0, %v545_v47 }
 0x23b   :  { %v521_v51 = vpop.permute.xlu1 %520  ;;  %v556_v52 = vld [vmem:[#allocation3 + $0x10] sm:$0xff] }
 0x23c   :  { %v530_v58 = vmax.f32 %v1580_v14, %v521_v51  ;;  %1102 = vmatmul.msk.f32.gmra.mxu3 %vm69_vm0, %v556_v52  ;;  %1117 = vmatmul.msk.f32.vlgmr.msrb.gmra.mxu0 %vm69_vm0, %v556_v52 }
 0x23e   :  { %v536_v55 = vmul.f32 %v1164_v35, %v530_v58 }
 0x240   :  { %v542_v56 = vadd.f32 %v1165_v38, %v536_v55  ;;  %v1144_v55 = vld [vmem:[%s1811_s7 + $0x38] sm:$0xff] }
 0x241   :  { %911 = vmatpush.msra.mxu0 %v1144_v55 }
 0x242   :  { %v546_v57 = vmax.f32 %v542_v56, 0.0  ;;  %v890_v56 = vld [vmem:[%s1811_s7 + $0x18] sm:$0xff] }
 0x243   :  { %934 = vmatpush.msra.mxu1 %v890_v56 }
 0x244   :  { %552 = vst.msk [vmem:[#allocation3 + $0x18] sm:$0xff] %vm69_vm0, %v546_v57  ;;  %v1143_v57 = vld [vmem:[%s1811_s7 + $0x30] sm:$0xff] }
 0x245   :  { %912 = vmatpush.msra.mxu0 %v1143_v57 }
 0x24b   :  { %v523_v59 = vpop.permute.xlu1 %522  ;;  %v557_v60 = vld [vmem:[#allocation3 + $0x18] sm:$0xff] }
 0x24c   :  { %v531_v61 = vmax.f32 %v1584_v23, %v523_v59  ;;  %1103 = vmatmul.msk.f32.gmra.mxu3 %vm69_vm0, %v557_v60  ;;  %1118 = vmatmul.msk.f32.gmra.mxu0 %vm69_vm0, %v557_v60  ;;  %v889_v59 = vld [vmem:[%s1811_s7 + $0x10] sm:$0xff] }
 0x24d   :  { %935 = vmatpush.msra.mxu1 %v889_v59  ;;  %v1014_v59 = vld [vmem:[%s1814_s1] sm:$0xff] }
 0x24e   :  { %v537_v62 = vmul.f32 %v1164_v35, %v531_v61  ;;  %v1142_v61 = vld [vmem:[%s1811_s7 + $0x28] sm:$0xff] }
 0x24f   :  { %913 = vmatpush.msra.mxu0 %v1142_v61 }
 0x250   :  { %v543_v63 = vadd.f32 %v1165_v38, %v537_v62  ;;  %v887_v62 = vld [vmem:[%s1811_s7] sm:$0xff] }
 0x252   :  { %v547_v0 = vmax.f32 %v543_v63, 0.0  ;;  %v1141_v63 = vld [vmem:[%s1811_s7 + $0x20] sm:$0xff] }
 0x253   :  { %914 = vmatpush.msra.mxu0 %v1141_v63 }
 0x254   :  { %553 = vst.msk [vmem:[#allocation3 + $0x20] sm:$0xff] %vm69_vm0, %v547_v0  ;;  %v1150_v0 = vld [vmem:[%s1811_s7 + $0x58] sm:$0xff] }
 0x255   :  { %962 = vmatpush.msrb.mxu0 %v1150_v0 }
 0x25b   :  { %v566_v1 = vld [vmem:[#allocation3 + $0x20] sm:$0xff] }
 0x25c   :  { %1104 = vmatmul.msk.f32.gmra.mxu3 %vm69_vm0, %v566_v1  ;;  %1119 = vmatmul.msk.f32.gmra.mxu0 %vm69_vm0, %v566_v1  ;;  %v1149_v1 = vld [vmem:[%s1811_s7 + $0x50] sm:$0xff] }
 0x25d   :  { %963 = vmatpush.msrb.mxu0 %v1149_v1 }
 0x25f   :  { %964 = vmatpush.msrb.mxu0 %v1148_v2 }
 0x264   :  { %1105 = vmatmul.msk.f32.vlgmr.msra.gmra.mxu3 %vm69_vm0, %v554_v4  ;;  %1120 = vmatmul.msk.f32.gmra.mxu0 %vm69_vm0, %v652_v5  ;;  %v1147_v4 = vld [vmem:[%s1811_s7 + $0x40] sm:$0xff]  ;;  %v805_v5 = vpop.f32.mrf.mxu2 }
 0x265   :  { %965 = vmatpush.msrb.mxu0 %v1147_v4 }
 0x26c   :  { %1106 = vmatmul.msk.f32.gmra.mxu3 %vm69_vm0, %v555_v44 }
 0x274   :  { %1107 = vmatmul.msk.f32.gmra.mxu3 %vm69_vm0, %v556_v52 }
 0x27c   :  { %1108 = vmatmul.msk.f32.gmra.mxu3 %vm69_vm0, %v557_v60  ;;  %v888_v60 = vld [vmem:[%s1811_s7 + $0x8] sm:$0xff] }
 0x27d   :  { %936 = vmatpush.msra.mxu1 %v888_v60  ;;  %v1015_v60 = vld [vmem:[%s1814_s1 + $0x8] sm:$0xff] }
 0x27f   :  { %937 = vmatpush.msra.mxu1 %v887_v62 }
 0x2af   :  { %v605_v14 = vpop.f32.mrf.mxu3 }
 0x2b9   :  { %v691_v23 = vpop.f32.mrf.mxu0 }
 0x2bf   :  { %v608_v15 = vpop.f32.mrf.mxu3 }
 0x2c9   :  { %v694_v32 = vpop.f32.mrf.mxu0 }
 0x2cf   :  { %v611_v19 = vpop.f32.mrf.mxu3 }
 0x2d9   :  { %v697_v40 = vpop.f32.mrf.mxu0 }
 0x2df   :  { %v614_v21 = vpop.f32.mrf.mxu3 }
 0x2e1   :  { %v700_v24 = vpop.f32.mrf.mxu0 }
 0x2e7   :  { %v637_v25 = vpop.f32.mrf.mxu3 }
 0x2e8   :  { %v638_v26 = vadd.f32 %v637_v25, %v605_v14 }
 0x2ea   :  { %v703_v28 = vadd.f32 %v691_v23, %v638_v26 }
 0x2ec   :  { %v709_v30 = vmul.f32 %v1166_v27, %v703_v28 }
 0x2ee   :  { %v715_v31 = vadd.f32 %v1167_v29, %v709_v30 }
 0x2ef   :  { %v640_v33 = vpop.f32.mrf.mxu3 }
 0x2f0   :  { %v719_v34 = vmax.f32 %v715_v31, 0.0  ;;  %v641_v35 = vadd.f32 %v640_v33, %v608_v15 }
 0x2f2   :  { %726 = vst.msk [vmem:[#allocation4 + $0x8] sm:$0xff] %vm723_vm1, %v719_v34  ;;  %v704_v37 = vadd.f32 %v694_v32, %v641_v35 }
 0x2f4   :  { %v710_v38 = vmul.f32 %v1166_v27, %v704_v37 }
 0x2f6   :  { %v716_v39 = vadd.f32 %v1167_v29, %v710_v38 }
 0x2f7   :  { %v643_v41 = vpop.f32.mrf.mxu3 }
 0x2f8   :  { %v720_v42 = vmax.f32 %v716_v39, 0.0  ;;  %v644_v7 = vadd.f32 %v643_v41, %v611_v19 }
 0x2f9   :  { %v731_v43 = vld [vmem:[#allocation4 + $0x8] sm:$0xff] }
 0x2fa   :  { %727 = vst.msk [vmem:[#allocation4 + $0x10] sm:$0xff] %vm723_vm1, %v720_v42  ;;  %v705_v9 = vadd.f32 %v697_v40, %v644_v7  ;;  %1125 = vmatmul.msk.f32.vlgmr.msrb.gmra.mxu1 %vm723_vm1, %v731_v43  ;;  %1130 = vmatmul.msk.f32.gmra.mxu2 %vm723_vm1, %v731_v43 }
 0x2fb   :  { %991 = vmatpush.msrb.mxu1 %v1155_v6 }
 0x2fc   :  { %v711_v44 = vmul.f32 %v1166_v27, %v705_v9 }
 0x2fd   :  { %992 = vmatpush.msrb.mxu1 %v1154_v8 }
 0x2fe   :  { %v717_v45 = vadd.f32 %v1167_v29, %v711_v44  ;;  %v15_v44 = vstv %s1813_s9 }
 0x2ff   :  { %v646_v46 = vpop.f32.mrf.mxu3  ;;  %993 = vmatpush.msrb.mxu1 %v1153_v10  ;;  %16 = vst [vmem:[#allocation5] sm:$0x1] %v15_v44 }
 0x300   :  { %v721_v47 = vmax.f32 %v717_v45, 0.0  ;;  %v647_v36 = vadd.f32 %v646_v46, %v614_v21 }
 0x301   :  { %v732_v48 = vld [vmem:[#allocation4 + $0x10] sm:$0xff]  ;;  %994 = vmatpush.msrb.mxu1 %v1152_v13 }
 0x302   :  { %728 = vst.msk [vmem:[#allocation4 + $0x18] sm:$0xff] %vm723_vm1, %v721_v47  ;;  %v706_v49 = vadd.f32 %v700_v24, %v647_v36  ;;  %1126 = vmatmul.msk.f32.gmra.mxu1 %vm723_vm1, %v732_v48  ;;  %1131 = vmatmul.msk.f32.gmra.mxu2 %vm723_vm1, %v732_v48 }
 0x303   :  { %1137 = vmatmul.msk.f32.vlgmr.msrb.gmra.mxu3 %vm723_vm1, %v732_v48  ;;  %v1170_v48 = vld [vmem:[%s1812_s8] ss:$0 sm:$0xff] }
 0x304   :  { %v712_v50 = vmul.f32 %v1166_v27, %v706_v49 }
 0x306   :  { %v718_v51 = vadd.f32 %v1167_v29, %v712_v50  ;;  %v1172_v55 = vld [vmem:[#allocation5] ss:$0 sm:$0xff] }
 0x308   :  { %v722_v52 = vmax.f32 %v718_v51, 0.0 }
 0x309   :  { %v733_v58 = vld [vmem:[#allocation4 + $0x18] sm:$0xff] }
 0x30a   :  { %729 = vst.msk [vmem:[#allocation4 + $0x20] sm:$0xff] %vm723_vm1, %v722_v52  ;;  %1127 = vmatmul.msk.f32.gmra.mxu1 %vm723_vm1, %v733_v58  ;;  %1132 = vmatmul.msk.f32.gmra.mxu2 %vm723_vm1, %v733_v58  ;;  %v1171_v52 = vld [vmem:[%s1812_s8 + $0x1] ss:$0 sm:$0xff] }
 0x30b   :  { %1138 = vmatmul.msk.f32.gmra.mxu3 %vm723_vm1, %v733_v58 }
 0x311   :  { %v738_v53 = vld [vmem:[#allocation4 + $0x20] sm:$0xff] }
 0x312   :  { %1128 = vmatmul.msk.f32.gmra.mxu1 %vm723_vm1, %v738_v53 }
 0x313   :  { %1139 = vmatmul.msk.f32.gmra.mxu3 %vm723_vm1, %v738_v53 }
 0x31b   :  { %1140 = vmatmul.msk.f32.gmra.mxu3 %vm723_vm1, %v820_v54  ;;  %v1175_v54 = vmov 0  }
 0x31c   :  { %1160 = vset.pattern.permute.xlu2 %v1175_v54  ;;  %1161 = vset.pattern.permute.xlu0 %v1175_v54 }
 0x377   :  { %v773_v3 = vpop.f32.mrf.mxu1 }
 0x378   :  { %v806_v11 = vadd.f32 %v805_v5, %v773_v3 }
 0x37d   :  { %v808_v18 = vpop.f32.mrf.mxu2 }
 0x37f   :  { %v776_v14 = vpop.f32.mrf.mxu1 }
 0x380   :  { %v809_v21 = vadd.f32 %v808_v18, %v776_v14 }
 0x385   :  { %v811_v28 = vpop.f32.mrf.mxu2 }
 0x386   :  { %v855_v15 = vpop.f32.mrf.mxu3 }
 0x387   :  { %v867_v16 = vadd.f32 %v855_v15, %v806_v11  ;;  %v779_v26 = vpop.f32.mrf.mxu1 }
 0x388   :  { %v812_v30 = vadd.f32 %v811_v28, %v779_v26 }
 0x389   :  { %v873_v19 = vmul.f32 %v1168_v12, %v867_v16 }
 0x38b   :  { %v879_v20 = vadd.f32 %v1169_v17, %v873_v19 }
 0x38d   :  { %v883_v22 = vmax.f32 %v879_v20, 0.0  ;;  %v814_v38 = vpop.f32.mrf.mxu2 }
 0x38e   :  { %v858_v23 = vpop.f32.mrf.mxu3 }
 0x38f   :  { %v868_v25 = vadd.f32 %v858_v23, %v809_v21  ;;  %1146 = vmatmul.msk.f32.vlgmr.msra.gmra.mxu1 %vm723_vm1, %v883_v22  ;;  %v782_v35 = vpop.f32.mrf.mxu1 }
 0x390   :  { %v815_v39 = vadd.f32 %v814_v38, %v782_v35 }
 0x391   :  { %v874_v27 = vmul.f32 %v1168_v12, %v868_v25 }
 0x393   :  { %v880_v29 = vadd.f32 %v1169_v17, %v874_v27 }
 0x395   :  { %v884_v31 = vmax.f32 %v880_v29, 0.0 }
 0x396   :  { %v861_v32 = vpop.f32.mrf.mxu3 }
 0x397   :  { %v869_v33 = vadd.f32 %v861_v32, %v812_v30  ;;  %1145 = vmatmul.msk.f32.vlgmr.msra.gmra.mxu0 %vm723_vm1, %v884_v31 }
 0x399   :  { %v875_v34 = vmul.f32 %v1168_v12, %v869_v33 }
 0x39b   :  { %v881_v37 = vadd.f32 %v1169_v17, %v875_v34 }
 0x39d   :  { %v885_v40 = vmax.f32 %v881_v37, 0.0 }
 0x39e   :  { %v864_v41 = vpop.f32.mrf.mxu3 }
 0x39f   :  { %v870_v42 = vadd.f32 %v864_v41, %v815_v39  ;;  %1151 = vmatmul.msk.f32.vlgmr.msrb.gmra.mxu0 %vm723_vm1, %v885_v40 }
 0x3a1   :  { %v876_v7 = vmul.f32 %v1168_v12, %v870_v42 }
 0x3a3   :  { %v882_v43 = vadd.f32 %v1169_v17, %v876_v7 }
 0x3a5   :  { %v886_v9 = vmax.f32 %v882_v43, 0.0 }
 0x3a7   :  { %1156 = vmatmul.msk.f32.vlgmr.msrb.gmra.mxu1 %vm723_vm1, %v886_v9 }
 0x40c   :  { %v939_v46 = vpop.f32.mrf.mxu1 }
 0x414   :  { %v916_v45 = vpop.f32.mrf.mxu0 }
 0x415   :  { %v940_v47 = vadd.f32 %v939_v46, %v916_v45 }
 0x41c   :  { %v967_v24 = vpop.f32.mrf.mxu0 }
 0x41d   :  { %v970_v36 = vadd.f32 %v967_v24, %v940_v47 }
 0x424   :  { %v996_v49 = vpop.f32.mrf.mxu1 }
 0x425   :  { %v999_v50 = vadd.f32 %v996_v49, %v970_v36 }
 0x427   :  { %v1002_v51 = vadd.f32 %v1170_v48, %v999_v50 }
 0x429   :  { %v1003_v58 = vmax.f32 %v1002_v51, 0.0 }
 0x42b   :  { %v1006_v53 = vmul.f32 %v1171_v52, %v1003_v58 }
 0x42d   :  { %1007 = vadd.xlane.f32.xlu2 %v1006_v53 }
 0x4a0   :  { %v1008_v56 = vpop.xlane.xlu2 %1007 }
 0x4a1   :  { %v1013_v57 = vadd.f32 %v1172_v55, %v1008_v56 }
 0x4a3   :  { %1018 = vperm.xlu2 %1160, %v1013_v57  }
 0x4fd   :  { %v1019_v61 = vpop.permute.xlu2 %1018 }
 0x4fe   :  { %v1021_v62 = vmul.f32 %v1019_v61, %v1014_v59  ;;  %v1022_v63 = vmul.f32 %v1019_v61, %v1015_v60 }
 0x500   :  { %1023 = vst [vmem:[%s1815_s10] sm:$0xff] %v1021_v62 }
 0x501   :  { %1024 = vst [vmem:[%s1815_s10 + $0x8] sm:$0xff] %v1022_v63 }

</bundles_post_ra>
